<compile_context>
chip_gen: v6e
topology: v6e:2x2x1
jax: 0.10.0
libtpu: 0.0.40
codegen_flags: <defaults>
</compile_context>

<pallas_src>
import jax
import jax.numpy as jnp
from jax import lax
from jax.experimental import pallas as pl
from jax.experimental.pallas import tpu as pltpu

# Small shapes consistent with the module's forward.
B, S, VOCAB, E, H = 8, 8, 50, 32, 32
LP = 128               # lane-padded width of one [fwd|bwd] gate pair (2H=64 -> 128)


def gru_attn_kernel(gi_ref,    # (S, B, 3*LP) f32: per slot t, lane blocks [r|z|n],
                               #   each block = [fwd gates(t) | bwd gates(S-1-t) | 0pad];
                               #   r/z hidden biases already folded in.
                    whh_ref,   # (LP, 3*LP) bf16 block-diag hidden weights, pad rows/cols 0
                    bhn_ref,   # (1, LP)  f32 n-gate hidden bias [fwd | bwd | 0pad]
                    w2_ref,    # (2, 3*LP) f32 fc2 weight, lane blocks = [avg | max | attn]
                    b2_ref,    # (1, 2)   f32 fc2 bias
                    out_ref):  # (B, 2)   f32 logits
    s, b, _ = gi_ref.shape
    lp = whh_ref.shape[0]          # 128: padded [fwd|bwd] gate-pair width
    h = H                          # per-direction hidden width (32)

    whh = whh_ref[...]                                    # loop-invariant (bf16)
    bhn = jnp.broadcast_to(bhn_ref[...], (b, lp))         # hoisted broadcast (once)

    # Fused bidirectional GRU recurrence, fully unrolled; carried state
    # hcat = [h_fwd(t) | h_bwd(S-1-t) | 0pad] stays f32 and lives in vregs.
    hcat = jnp.zeros((b, lp), jnp.float32)
    hs = []
    for t in range(s):
        gi = gi_ref[t]                                    # (B, 3*LP) lane-dense slab
        gh = jnp.dot(hcat.astype(jnp.bfloat16), whh,
                     preferred_element_type=jnp.float32)  # one small MXU op / step
        r = jax.nn.sigmoid(gi[:, :lp] + gh[:, :lp])               # 128-aligned slices
        z = jax.nn.sigmoid(gi[:, lp:2 * lp] + gh[:, lp:2 * lp])
        n = jnp.tanh(gi[:, 2 * lp:] + r * (gh[:, 2 * lp:] + bhn))
        hcat = (1.0 - z) * n + z * hcat
        hs.append(hcat)                                   # kept live in vregs

    fh = hs[-1]                    # [h_fwd(S-1) | h_bwd(0) | 0] == cat(hn)

    # Time-align the bwd half: g(t) = [h_fwd(t) | h_bwd(t) | 0pad].
    lane = lax.broadcasted_iota(jnp.int32, (b, lp), 1)
    fwd_mask = lane < h
    g = [jnp.where(fwd_mask, hs[t], hs[s - 1 - t]) for t in range(s)]

    # dot attention: per-step logit (cross-lane reduce), softmax over time.
    logits = [jnp.sum(gt * fh, axis=-1, keepdims=True) for gt in g]   # (B,1) each
    m = logits[0]
    for a in logits[1:]:
        m = jnp.maximum(m, a)
    e = [jnp.exp(a - m) for a in logits]
    denom = e[0]
    for x in e[1:]:
        denom = denom + x
    inv = 1.0 / denom              # exact divide; off the critical path

    attn = g[0] * (e[0] * inv)
    avg = g[0]
    mx = g[0]
    for t in range(1, s):
        attn = attn + g[t] * (e[t] * inv)
        avg = avg + g[t]
        mx = jnp.maximum(mx, g[t])
    avg = avg * (1.0 / s)

    # fc2 on the VPU (only 2 output columns; keep the MXU out of the epilogue).
    # dropout is identity at inference; fc1 is unused for attention_type='dot'.
    w2 = w2_ref[...]                                      # (2, 3*LP)
    contrib = (avg[:, None, :] * w2[None, :, :lp]
               + mx[:, None, :] * w2[None, :, lp:2 * lp]
               + attn[:, None, :] * w2[None, :, 2 * lp:])  # (B, 2, LP)
    out_ref[...] = jnp.sum(contrib, axis=-1) + b2_ref[...]


def init_params(key):
    ks = jax.random.split(key, 11)
    scale = 1.0 / jnp.sqrt(jnp.float32(H))
    u = lambda k, shp: jax.random.uniform(k, shp, jnp.float32, -scale, scale)
    return dict(
        emb_matrix=jax.random.normal(ks[0], (VOCAB, E), jnp.float32) * 0.1,
        # natural layout: weights stored transposed (in_dim, 3H), cols = [r|z|n]
        wih_f=u(ks[1], (E, 3 * H)), whh_f=u(ks[2], (H, 3 * H)),
        bih_f=u(ks[3], (1, 3 * H)), bhh_f=u(ks[4], (1, 3 * H)),
        wih_b=u(ks[5], (E, 3 * H)), whh_b=u(ks[6], (H, 3 * H)),
        bih_b=u(ks[7], (1, 3 * H)), bhh_b=u(ks[8], (1, 3 * H)),
        w2=u(ks[9], (6 * H, 2)), b2=u(ks[10], (1, 2)),
    )


def pack_params(params):
    """One-time re-layout of the natural GRU params for the fused kernel.

    Kernel lane layout per gate block (width LP=128):
        [gate_fwd (H) | gate_bwd (H) | zero pad (LP-2H)]
    with the three blocks ordered [r | z | n].  The r/z hidden biases are
    folded into the (precomputed) input-projection bias; the n-gate hidden
    bias stays separate because it sits inside r*(...).
    """
    h = H
    pad = LP - 2 * h

    def gcols(w, g):          # (in, 3H) -> gate-g columns (in, H)
        return w[:, g * h:(g + 1) * h]

    def gbias(bvec, g):       # (1, 3H) -> (H,)
        return bvec[0, g * h:(g + 1) * h]

    # input weights -> (E, 3*LP), columns already in the kernel's layout
    wih_blocks = []
    for g in range(3):
        blk = jnp.concatenate([gcols(params["wih_f"], g),
                               gcols(params["wih_b"], g)], axis=1)   # (E, 2H)
        wih_blocks.append(jnp.pad(blk, ((0, 0), (0, pad))))
    wih_packed = jnp.concatenate(wih_blocks, axis=1)                 # (E, 3*LP)

    # input bias with r/z hidden biases folded in -> (3*LP,)
    bih_blocks = []
    for g in range(3):
        bf = gbias(params["bih_f"], g)
        bb = gbias(params["bih_b"], g)
        if g < 2:   # r, z: hidden bias is outside r*(...), so fold it here
            bf = bf + gbias(params["bhh_f"], g)
            bb = bb + gbias(params["bhh_b"], g)
        bih_blocks.append(jnp.pad(jnp.concatenate([bf, bb]), (0, pad)))
    bih_packed = jnp.concatenate(bih_blocks)                         # (3*LP,)

    # n-gate hidden bias stays in the kernel loop
    bhn_packed = jnp.pad(jnp.concatenate([gbias(params["bhh_f"], 2),
                                          gbias(params["bhh_b"], 2)]),
                         (0, pad))[None, :]                          # (1, LP)

    # hidden weights: block-diag per gate, zero-padded rows/cols, bf16 for MXU
    def bd(g):
        blk = jnp.zeros((LP, LP), jnp.float32)
        blk = blk.at[:h, :h].set(gcols(params["whh_f"], g))
        blk = blk.at[h:2 * h, h:2 * h].set(gcols(params["whh_b"], g))
        return blk
    whh_packed = jnp.concatenate([bd(0), bd(1), bd(2)],
                                 axis=1).astype(jnp.bfloat16)        # (LP, 3*LP)

    # fc2 weight, transposed + lane-padded per pooled-feature block
    w2 = params["w2"]                                                # (6H, 2)
    w2_blocks = []
    for p in range(3):                                               # avg | max | attn
        blk = w2[p * 2 * h:(p + 1) * 2 * h, :].T                     # (2, 2H)
        w2_blocks.append(jnp.pad(blk, ((0, 0), (0, pad))))
    w2t_packed = jnp.concatenate(w2_blocks, axis=1)                  # (2, 3*LP)

    # static lane mask selecting the bwd half of each gate block (used once per
    # call in the wrapper to time-reverse the precomputed bwd gates)
    lane = jnp.arange(3 * LP)
    bwd_lane_mask = (lane % LP >= h) & (lane % LP < 2 * h)           # (3*LP,) bool

    return dict(emb_matrix=params["emb_matrix"],
                wih_packed=wih_packed, bih_packed=bih_packed,
                bhn_packed=bhn_packed, whh_packed=whh_packed,
                w2t_packed=w2t_packed, b2=params["b2"],
                bwd_lane_mask=bwd_lane_mask)


@jax.jit
def gru_attn_forward(x_ids, packed):
    bsz, seq = x_ids.shape
    # Plain-JAX glue (off the latency-critical recurrence): embedding gather +
    # ONE hoisted input-projection matmul for both directions / all gates,
    # emitted directly in the kernel's padded lane layout, then a single
    # lane-masked select to time-reverse the bwd gates.
    emb = packed["emb_matrix"][x_ids]                          # (B, S, E)
    emb_t = jnp.transpose(emb, (1, 0, 2))                      # (S, B, E)
    gi = emb_t.reshape(seq * bsz, -1) @ packed["wih_packed"] + packed["bih_packed"]
    gi = gi.reshape(seq, bsz, 3 * LP)
    gi_loop = jnp.where(packed["bwd_lane_mask"], gi[::-1], gi)  # bwd lanes <- time S-1-t

    vmem = pl.BlockSpec(memory_space=pltpu.MemorySpace.VMEM)
    # Gridless on purpose: the whole problem is ~100 KB of VMEM.  For
    # production sizes, add a leading batch grid axis with
    # compiler_params=pltpu.CompilerParams(dimension_semantics=("parallel",))
    # (2 TensorCores on v7x) and re-derive tile sizes for v7x's 64 MiB VMEM.
    return pl.pallas_call(
        gru_attn_kernel,
        out_shape=jax.ShapeDtypeStruct((bsz, 2), jnp.float32),
        in_specs=[vmem] * 5,
        out_specs=vmem,
    )(gi_loop, packed["whh_packed"], packed["bhn_packed"],
      packed["w2t_packed"], packed["b2"])


def reference_forward(x_ids, params):
    # pure-JAX mirror of the PyTorch module (eval mode), natural param layout
    emb = params["emb_matrix"][x_ids]            # (B, S, E)
    emb_t = jnp.transpose(emb, (1, 0, 2))        # (S, B, E)

    def run_dir(wih, whh, bih, bhh, reverse):
        def cell(h, x_t):
            gi = x_t @ wih + bih[0]
            gh = h @ whh + bhh[0]
            i_r, i_z, i_n = jnp.split(gi, 3, axis=-1)
            h_r, h_z, h_n = jnp.split(gh, 3, axis=-1)
            r = jax.nn.sigmoid(i_r + h_r)
            z = jax.nn.sigmoid(i_z + h_z)
            n = jnp.tanh(i_n + r * h_n)
            h_new = (1.0 - z) * n + z * h
            return h_new, h_new
        h0 = jnp.zeros((emb_t.shape[1], H), jnp.float32)
        hf, outs = lax.scan(cell, h0, emb_t, reverse=reverse)
        return hf, outs

    hf, of = run_dir(params["wih_f"], params["whh_f"],
                     params["bih_f"], params["bhh_f"], False)
    hb, ob = run_dir(params["wih_b"], params["whh_b"],
                     params["bih_b"], params["bhh_b"], True)
    g = jnp.transpose(jnp.concatenate([of, ob], axis=-1), (1, 0, 2))  # (B, S, 2H)
    fh = jnp.concatenate([hf, hb], axis=-1)                           # (B, 2H)
    aw = jax.nn.softmax(jnp.einsum('bsd,bd->bs', g, fh), axis=1)
    attn = jnp.einsum('bsd,bs->bd', g, aw)
    avg = jnp.mean(g, axis=1)
    mx = jnp.max(g, axis=1)
    cat = jnp.concatenate([avg, mx, attn], axis=-1)
    return cat @ params["w2"] + params["b2"][0]


if __name__ == "__main__":
    key = jax.random.PRNGKey(0)
    pkey, xkey = jax.random.split(key)
    params = init_params(pkey)
    packed = pack_params(params)
    x = jax.random.randint(xkey, (B, S), 0, VOCAB, dtype=jnp.int32)

    out = gru_attn_forward(x, packed)
    jax.block_until_ready(out)
    assert out.shape == (B, 2) and out.dtype == jnp.float32

    ref = reference_forward(x, params)
    # tolerance covers the bf16 MXU operands on the recurrence matmul
    # (f32 accumulation / f32 carried state); everything else is exact-path.
    assert jnp.allclose(out, ref, rtol=2e-2, atol=2e-2), (out, ref)

    print("KERNEL_OK")
</pallas_src>

<mosaic_0001>
module attributes {stable_mosaic.version = 11 : i64} {
  func.func @gru_attn_kernel(%arg0: memref<8x8x384xf32, #tpu.memory_space<vmem>>, %arg1: memref<128x384xbf16, #tpu.memory_space<vmem>>, %arg2: memref<1x128xf32, #tpu.memory_space<vmem>>, %arg3: memref<2x384xf32, #tpu.memory_space<vmem>>, %arg4: memref<1x2xf32, #tpu.memory_space<vmem>>, %arg5: memref<8x2xf32, #tpu.memory_space<vmem>>) attributes {dimension_semantics = [], scalar_prefetch = 0 : i64, scratch_operands = 0 : i64, tpu.core_type = #tpu.core_type<tc>} {
    %c0 = arith.constant 0 : index
    %c0_0 = arith.constant 0 : index
    %0 = vector.load %arg1[%c0, %c0_0] : memref<128x384xbf16, #tpu.memory_space<vmem>>, vector<128x384xbf16>
    %c0_1 = arith.constant 0 : index
    %c0_2 = arith.constant 0 : index
    %1 = vector.load %arg2[%c0_1, %c0_2] : memref<1x128xf32, #tpu.memory_space<vmem>>, vector<1x128xf32>
    %2 = vector.shape_cast %1 : vector<1x128xf32> to vector<1x128xf32>
    %3 = vector.broadcast %2 : vector<1x128xf32> to vector<8x128xf32>
    %cst = arith.constant 0.000000e+00 : f32
    %4 = vector.broadcast %cst : f32 to vector<8x128xf32>
    %c0_3 = arith.constant 0 : index
    %c0_4 = arith.constant 0 : index
    %c0_5 = arith.constant 0 : index
    %5 = vector.load %arg0[%c0_3, %c0_4, %c0_5] : memref<8x8x384xf32, #tpu.memory_space<vmem>>, vector<1x8x384xf32>
    %6 = vector.shape_cast %5 : vector<1x8x384xf32> to vector<8x384xf32>
    %7 = arith.truncf %4 : vector<8x128xf32> to vector<8x128xbf16>
    %cst_6 = arith.constant dense<0.000000e+00> : vector<8x384xf32>
    %8 = tpu.matmul %7, %0, %cst_6 {dimension_numbers = #tpu.dot_dimension_numbers<[1], [0], [0], [1], [0, 0, 1, 1], [], []>} : vector<8x128xbf16>, vector<128x384xbf16>, vector<8x384xf32> -> vector<8x384xf32>
    %9 = vector.extract_strided_slice %6 {offsets = [0, 0], sizes = [8, 128], strides = [1, 1]} : vector<8x384xf32> to vector<8x128xf32>
    %10 = vector.extract_strided_slice %8 {offsets = [0, 0], sizes = [8, 128], strides = [1, 1]} : vector<8x384xf32> to vector<8x128xf32>
    %11 = arith.addf %9, %10 : vector<8x128xf32>
    %12 = arith.negf %11 : vector<8x128xf32>
    %13 = math.exp %12 : vector<8x128xf32>
    %cst_7 = arith.constant 1.000000e+00 : f32
    %14 = vector.broadcast %cst_7 : f32 to vector<8x128xf32>
    %15 = arith.addf %14, %13 : vector<8x128xf32>
    %16 = arith.divf %14, %15 : vector<8x128xf32>
    %17 = vector.extract_strided_slice %6 {offsets = [0, 128], sizes = [8, 128], strides = [1, 1]} : vector<8x384xf32> to vector<8x128xf32>
    %18 = vector.extract_strided_slice %8 {offsets = [0, 128], sizes = [8, 128], strides = [1, 1]} : vector<8x384xf32> to vector<8x128xf32>
    %19 = arith.addf %17, %18 : vector<8x128xf32>
    %20 = arith.negf %19 : vector<8x128xf32>
    %21 = math.exp %20 : vector<8x128xf32>
    %cst_8 = arith.constant 1.000000e+00 : f32
    %22 = vector.broadcast %cst_8 : f32 to vector<8x128xf32>
    %23 = arith.addf %22, %21 : vector<8x128xf32>
    %24 = arith.divf %22, %23 : vector<8x128xf32>
    %25 = vector.extract_strided_slice %6 {offsets = [0, 256], sizes = [8, 128], strides = [1, 1]} : vector<8x384xf32> to vector<8x128xf32>
    %26 = vector.extract_strided_slice %8 {offsets = [0, 256], sizes = [8, 128], strides = [1, 1]} : vector<8x384xf32> to vector<8x128xf32>
    %27 = arith.addf %26, %3 : vector<8x128xf32>
    %28 = arith.mulf %16, %27 : vector<8x128xf32>
    %29 = arith.addf %25, %28 : vector<8x128xf32>
    %30 = math.tanh %29 : vector<8x128xf32>
    %cst_9 = arith.constant 1.000000e+00 : f32
    %31 = vector.broadcast %cst_9 : f32 to vector<8x128xf32>
    %32 = arith.subf %31, %24 : vector<8x128xf32>
    %33 = arith.mulf %32, %30 : vector<8x128xf32>
    %34 = arith.mulf %24, %4 : vector<8x128xf32>
    %35 = arith.addf %33, %34 : vector<8x128xf32>
    %c1 = arith.constant 1 : index
    %c0_10 = arith.constant 0 : index
    %c0_11 = arith.constant 0 : index
    %36 = vector.load %arg0[%c1, %c0_10, %c0_11] : memref<8x8x384xf32, #tpu.memory_space<vmem>>, vector<1x8x384xf32>
    %37 = vector.shape_cast %36 : vector<1x8x384xf32> to vector<8x384xf32>
    %38 = arith.truncf %35 : vector<8x128xf32> to vector<8x128xbf16>
    %cst_12 = arith.constant dense<0.000000e+00> : vector<8x384xf32>
    %39 = tpu.matmul %38, %0, %cst_12 {dimension_numbers = #tpu.dot_dimension_numbers<[1], [0], [0], [1], [0, 0, 1, 1], [], []>} : vector<8x128xbf16>, vector<128x384xbf16>, vector<8x384xf32> -> vector<8x384xf32>
    %40 = vector.extract_strided_slice %37 {offsets = [0, 0], sizes = [8, 128], strides = [1, 1]} : vector<8x384xf32> to vector<8x128xf32>
    %41 = vector.extract_strided_slice %39 {offsets = [0, 0], sizes = [8, 128], strides = [1, 1]} : vector<8x384xf32> to vector<8x128xf32>
    %42 = arith.addf %40, %41 : vector<8x128xf32>
    %43 = arith.negf %42 : vector<8x128xf32>
    %44 = math.exp %43 : vector<8x128xf32>
    %cst_13 = arith.constant 1.000000e+00 : f32
    %45 = vector.broadcast %cst_13 : f32 to vector<8x128xf32>
    %46 = arith.addf %45, %44 : vector<8x128xf32>
    %47 = arith.divf %45, %46 : vector<8x128xf32>
    %48 = vector.extract_strided_slice %37 {offsets = [0, 128], sizes = [8, 128], strides = [1, 1]} : vector<8x384xf32> to vector<8x128xf32>
    %49 = vector.extract_strided_slice %39 {offsets = [0, 128], sizes = [8, 128], strides = [1, 1]} : vector<8x384xf32> to vector<8x128xf32>
    %50 = arith.addf %48, %49 : vector<8x128xf32>
    %51 = arith.negf %50 : vector<8x128xf32>
    %52 = math.exp %51 : vector<8x128xf32>
    %cst_14 = arith.constant 1.000000e+00 : f32
    %53 = vector.broadcast %cst_14 : f32 to vector<8x128xf32>
    %54 = arith.addf %53, %52 : vector<8x128xf32>
    %55 = arith.divf %53, %54 : vector<8x128xf32>
    %56 = vector.extract_strided_slice %37 {offsets = [0, 256], sizes = [8, 128], strides = [1, 1]} : vector<8x384xf32> to vector<8x128xf32>
    %57 = vector.extract_strided_slice %39 {offsets = [0, 256], sizes = [8, 128], strides = [1, 1]} : vector<8x384xf32> to vector<8x128xf32>
    %58 = arith.addf %57, %3 : vector<8x128xf32>
    %59 = arith.mulf %47, %58 : vector<8x128xf32>
    %60 = arith.addf %56, %59 : vector<8x128xf32>
    %61 = math.tanh %60 : vector<8x128xf32>
    %cst_15 = arith.constant 1.000000e+00 : f32
    %62 = vector.broadcast %cst_15 : f32 to vector<8x128xf32>
    %63 = arith.subf %62, %55 : vector<8x128xf32>
    %64 = arith.mulf %63, %61 : vector<8x128xf32>
    %65 = arith.mulf %55, %35 : vector<8x128xf32>
    %66 = arith.addf %64, %65 : vector<8x128xf32>
    %c2 = arith.constant 2 : index
    %c0_16 = arith.constant 0 : index
    %c0_17 = arith.constant 0 : index
    %67 = vector.load %arg0[%c2, %c0_16, %c0_17] : memref<8x8x384xf32, #tpu.memory_space<vmem>>, vector<1x8x384xf32>
    %68 = vector.shape_cast %67 : vector<1x8x384xf32> to vector<8x384xf32>
    %69 = arith.truncf %66 : vector<8x128xf32> to vector<8x128xbf16>
    %cst_18 = arith.constant dense<0.000000e+00> : vector<8x384xf32>
    %70 = tpu.matmul %69, %0, %cst_18 {dimension_numbers = #tpu.dot_dimension_numbers<[1], [0], [0], [1], [0, 0, 1, 1], [], []>} : vector<8x128xbf16>, vector<128x384xbf16>, vector<8x384xf32> -> vector<8x384xf32>
    %71 = vector.extract_strided_slice %68 {offsets = [0, 0], sizes = [8, 128], strides = [1, 1]} : vector<8x384xf32> to vector<8x128xf32>
    %72 = vector.extract_strided_slice %70 {offsets = [0, 0], sizes = [8, 128], strides = [1, 1]} : vector<8x384xf32> to vector<8x128xf32>
    %73 = arith.addf %71, %72 : vector<8x128xf32>
    %74 = arith.negf %73 : vector<8x128xf32>
    %75 = math.exp %74 : vector<8x128xf32>
    %cst_19 = arith.constant 1.000000e+00 : f32
    %76 = vector.broadcast %cst_19 : f32 to vector<8x128xf32>
    %77 = arith.addf %76, %75 : vector<8x128xf32>
    %78 = arith.divf %76, %77 : vector<8x128xf32>
    %79 = vector.extract_strided_slice %68 {offsets = [0, 128], sizes = [8, 128], strides = [1, 1]} : vector<8x384xf32> to vector<8x128xf32>
    %80 = vector.extract_strided_slice %70 {offsets = [0, 128], sizes = [8, 128], strides = [1, 1]} : vector<8x384xf32> to vector<8x128xf32>
    %81 = arith.addf %79, %80 : vector<8x128xf32>
    %82 = arith.negf %81 : vector<8x128xf32>
    %83 = math.exp %82 : vector<8x128xf32>
    %cst_20 = arith.constant 1.000000e+00 : f32
    %84 = vector.broadcast %cst_20 : f32 to vector<8x128xf32>
    %85 = arith.addf %84, %83 : vector<8x128xf32>
    %86 = arith.divf %84, %85 : vector<8x128xf32>
    %87 = vector.extract_strided_slice %68 {offsets = [0, 256], sizes = [8, 128], strides = [1, 1]} : vector<8x384xf32> to vector<8x128xf32>
    %88 = vector.extract_strided_slice %70 {offsets = [0, 256], sizes = [8, 128], strides = [1, 1]} : vector<8x384xf32> to vector<8x128xf32>
    %89 = arith.addf %88, %3 : vector<8x128xf32>
    %90 = arith.mulf %78, %89 : vector<8x128xf32>
    %91 = arith.addf %87, %90 : vector<8x128xf32>
    %92 = math.tanh %91 : vector<8x128xf32>
    %cst_21 = arith.constant 1.000000e+00 : f32
    %93 = vector.broadcast %cst_21 : f32 to vector<8x128xf32>
    %94 = arith.subf %93, %86 : vector<8x128xf32>
    %95 = arith.mulf %94, %92 : vector<8x128xf32>
    %96 = arith.mulf %86, %66 : vector<8x128xf32>
    %97 = arith.addf %95, %96 : vector<8x128xf32>
    %c3 = arith.constant 3 : index
    %c0_22 = arith.constant 0 : index
    %c0_23 = arith.constant 0 : index
    %98 = vector.load %arg0[%c3, %c0_22, %c0_23] : memref<8x8x384xf32, #tpu.memory_space<vmem>>, vector<1x8x384xf32>
    %99 = vector.shape_cast %98 : vector<1x8x384xf32> to vector<8x384xf32>
    %100 = arith.truncf %97 : vector<8x128xf32> to vector<8x128xbf16>
    %cst_24 = arith.constant dense<0.000000e+00> : vector<8x384xf32>
    %101 = tpu.matmul %100, %0, %cst_24 {dimension_numbers = #tpu.dot_dimension_numbers<[1], [0], [0], [1], [0, 0, 1, 1], [], []>} : vector<8x128xbf16>, vector<128x384xbf16>, vector<8x384xf32> -> vector<8x384xf32>
    %102 = vector.extract_strided_slice %99 {offsets = [0, 0], sizes = [8, 128], strides = [1, 1]} : vector<8x384xf32> to vector<8x128xf32>
    %103 = vector.extract_strided_slice %101 {offsets = [0, 0], sizes = [8, 128], strides = [1, 1]} : vector<8x384xf32> to vector<8x128xf32>
    %104 = arith.addf %102, %103 : vector<8x128xf32>
    %105 = arith.negf %104 : vector<8x128xf32>
    %106 = math.exp %105 : vector<8x128xf32>
    %cst_25 = arith.constant 1.000000e+00 : f32
    %107 = vector.broadcast %cst_25 : f32 to vector<8x128xf32>
    %108 = arith.addf %107, %106 : vector<8x128xf32>
    %109 = arith.divf %107, %108 : vector<8x128xf32>
    %110 = vector.extract_strided_slice %99 {offsets = [0, 128], sizes = [8, 128], strides = [1, 1]} : vector<8x384xf32> to vector<8x128xf32>
    %111 = vector.extract_strided_slice %101 {offsets = [0, 128], sizes = [8, 128], strides = [1, 1]} : vector<8x384xf32> to vector<8x128xf32>
    %112 = arith.addf %110, %111 : vector<8x128xf32>
    %113 = arith.negf %112 : vector<8x128xf32>
    %114 = math.exp %113 : vector<8x128xf32>
    %cst_26 = arith.constant 1.000000e+00 : f32
    %115 = vector.broadcast %cst_26 : f32 to vector<8x128xf32>
    %116 = arith.addf %115, %114 : vector<8x128xf32>
    %117 = arith.divf %115, %116 : vector<8x128xf32>
    %118 = vector.extract_strided_slice %99 {offsets = [0, 256], sizes = [8, 128], strides = [1, 1]} : vector<8x384xf32> to vector<8x128xf32>
    %119 = vector.extract_strided_slice %101 {offsets = [0, 256], sizes = [8, 128], strides = [1, 1]} : vector<8x384xf32> to vector<8x128xf32>
    %120 = arith.addf %119, %3 : vector<8x128xf32>
    %121 = arith.mulf %109, %120 : vector<8x128xf32>
    %122 = arith.addf %118, %121 : vector<8x128xf32>
    %123 = math.tanh %122 : vector<8x128xf32>
    %cst_27 = arith.constant 1.000000e+00 : f32
    %124 = vector.broadcast %cst_27 : f32 to vector<8x128xf32>
    %125 = arith.subf %124, %117 : vector<8x128xf32>
    %126 = arith.mulf %125, %123 : vector<8x128xf32>
    %127 = arith.mulf %117, %97 : vector<8x128xf32>
    %128 = arith.addf %126, %127 : vector<8x128xf32>
    %c4 = arith.constant 4 : index
    %c0_28 = arith.constant 0 : index
    %c0_29 = arith.constant 0 : index
    %129 = vector.load %arg0[%c4, %c0_28, %c0_29] : memref<8x8x384xf32, #tpu.memory_space<vmem>>, vector<1x8x384xf32>
    %130 = vector.shape_cast %129 : vector<1x8x384xf32> to vector<8x384xf32>
    %131 = arith.truncf %128 : vector<8x128xf32> to vector<8x128xbf16>
    %cst_30 = arith.constant dense<0.000000e+00> : vector<8x384xf32>
    %132 = tpu.matmul %131, %0, %cst_30 {dimension_numbers = #tpu.dot_dimension_numbers<[1], [0], [0], [1], [0, 0, 1, 1], [], []>} : vector<8x128xbf16>, vector<128x384xbf16>, vector<8x384xf32> -> vector<8x384xf32>
    %133 = vector.extract_strided_slice %130 {offsets = [0, 0], sizes = [8, 128], strides = [1, 1]} : vector<8x384xf32> to vector<8x128xf32>
    %134 = vector.extract_strided_slice %132 {offsets = [0, 0], sizes = [8, 128], strides = [1, 1]} : vector<8x384xf32> to vector<8x128xf32>
    %135 = arith.addf %133, %134 : vector<8x128xf32>
    %136 = arith.negf %135 : vector<8x128xf32>
    %137 = math.exp %136 : vector<8x128xf32>
    %cst_31 = arith.constant 1.000000e+00 : f32
    %138 = vector.broadcast %cst_31 : f32 to vector<8x128xf32>
    %139 = arith.addf %138, %137 : vector<8x128xf32>
    %140 = arith.divf %138, %139 : vector<8x128xf32>
    %141 = vector.extract_strided_slice %130 {offsets = [0, 128], sizes = [8, 128], strides = [1, 1]} : vector<8x384xf32> to vector<8x128xf32>
    %142 = vector.extract_strided_slice %132 {offsets = [0, 128], sizes = [8, 128], strides = [1, 1]} : vector<8x384xf32> to vector<8x128xf32>
    %143 = arith.addf %141, %142 : vector<8x128xf32>
    %144 = arith.negf %143 : vector<8x128xf32>
    %145 = math.exp %144 : vector<8x128xf32>
    %cst_32 = arith.constant 1.000000e+00 : f32
    %146 = vector.broadcast %cst_32 : f32 to vector<8x128xf32>
    %147 = arith.addf %146, %145 : vector<8x128xf32>
    %148 = arith.divf %146, %147 : vector<8x128xf32>
    %149 = vector.extract_strided_slice %130 {offsets = [0, 256], sizes = [8, 128], strides = [1, 1]} : vector<8x384xf32> to vector<8x128xf32>
    %150 = vector.extract_strided_slice %132 {offsets = [0, 256], sizes = [8, 128], strides = [1, 1]} : vector<8x384xf32> to vector<8x128xf32>
    %151 = arith.addf %150, %3 : vector<8x128xf32>
    %152 = arith.mulf %140, %151 : vector<8x128xf32>
    %153 = arith.addf %149, %152 : vector<8x128xf32>
    %154 = math.tanh %153 : vector<8x128xf32>
    %cst_33 = arith.constant 1.000000e+00 : f32
    %155 = vector.broadcast %cst_33 : f32 to vector<8x128xf32>
    %156 = arith.subf %155, %148 : vector<8x128xf32>
    %157 = arith.mulf %156, %154 : vector<8x128xf32>
    %158 = arith.mulf %148, %128 : vector<8x128xf32>
    %159 = arith.addf %157, %158 : vector<8x128xf32>
    %c5 = arith.constant 5 : index
    %c0_34 = arith.constant 0 : index
    %c0_35 = arith.constant 0 : index
    %160 = vector.load %arg0[%c5, %c0_34, %c0_35] : memref<8x8x384xf32, #tpu.memory_space<vmem>>, vector<1x8x384xf32>
    %161 = vector.shape_cast %160 : vector<1x8x384xf32> to vector<8x384xf32>
    %162 = arith.truncf %159 : vector<8x128xf32> to vector<8x128xbf16>
    %cst_36 = arith.constant dense<0.000000e+00> : vector<8x384xf32>
    %163 = tpu.matmul %162, %0, %cst_36 {dimension_numbers = #tpu.dot_dimension_numbers<[1], [0], [0], [1], [0, 0, 1, 1], [], []>} : vector<8x128xbf16>, vector<128x384xbf16>, vector<8x384xf32> -> vector<8x384xf32>
    %164 = vector.extract_strided_slice %161 {offsets = [0, 0], sizes = [8, 128], strides = [1, 1]} : vector<8x384xf32> to vector<8x128xf32>
    %165 = vector.extract_strided_slice %163 {offsets = [0, 0], sizes = [8, 128], strides = [1, 1]} : vector<8x384xf32> to vector<8x128xf32>
    %166 = arith.addf %164, %165 : vector<8x128xf32>
    %167 = arith.negf %166 : vector<8x128xf32>
    %168 = math.exp %167 : vector<8x128xf32>
    %cst_37 = arith.constant 1.000000e+00 : f32
    %169 = vector.broadcast %cst_37 : f32 to vector<8x128xf32>
    %170 = arith.addf %169, %168 : vector<8x128xf32>
    %171 = arith.divf %169, %170 : vector<8x128xf32>
    %172 = vector.extract_strided_slice %161 {offsets = [0, 128], sizes = [8, 128], strides = [1, 1]} : vector<8x384xf32> to vector<8x128xf32>
    %173 = vector.extract_strided_slice %163 {offsets = [0, 128], sizes = [8, 128], strides = [1, 1]} : vector<8x384xf32> to vector<8x128xf32>
    %174 = arith.addf %172, %173 : vector<8x128xf32>
    %175 = arith.negf %174 : vector<8x128xf32>
    %176 = math.exp %175 : vector<8x128xf32>
    %cst_38 = arith.constant 1.000000e+00 : f32
    %177 = vector.broadcast %cst_38 : f32 to vector<8x128xf32>
    %178 = arith.addf %177, %176 : vector<8x128xf32>
    %179 = arith.divf %177, %178 : vector<8x128xf32>
    %180 = vector.extract_strided_slice %161 {offsets = [0, 256], sizes = [8, 128], strides = [1, 1]} : vector<8x384xf32> to vector<8x128xf32>
    %181 = vector.extract_strided_slice %163 {offsets = [0, 256], sizes = [8, 128], strides = [1, 1]} : vector<8x384xf32> to vector<8x128xf32>
    %182 = arith.addf %181, %3 : vector<8x128xf32>
    %183 = arith.mulf %171, %182 : vector<8x128xf32>
    %184 = arith.addf %180, %183 : vector<8x128xf32>
    %185 = math.tanh %184 : vector<8x128xf32>
    %cst_39 = arith.constant 1.000000e+00 : f32
    %186 = vector.broadcast %cst_39 : f32 to vector<8x128xf32>
    %187 = arith.subf %186, %179 : vector<8x128xf32>
    %188 = arith.mulf %187, %185 : vector<8x128xf32>
    %189 = arith.mulf %179, %159 : vector<8x128xf32>
    %190 = arith.addf %188, %189 : vector<8x128xf32>
    %c6 = arith.constant 6 : index
    %c0_40 = arith.constant 0 : index
    %c0_41 = arith.constant 0 : index
    %191 = vector.load %arg0[%c6, %c0_40, %c0_41] : memref<8x8x384xf32, #tpu.memory_space<vmem>>, vector<1x8x384xf32>
    %192 = vector.shape_cast %191 : vector<1x8x384xf32> to vector<8x384xf32>
    %193 = arith.truncf %190 : vector<8x128xf32> to vector<8x128xbf16>
    %cst_42 = arith.constant dense<0.000000e+00> : vector<8x384xf32>
    %194 = tpu.matmul %193, %0, %cst_42 {dimension_numbers = #tpu.dot_dimension_numbers<[1], [0], [0], [1], [0, 0, 1, 1], [], []>} : vector<8x128xbf16>, vector<128x384xbf16>, vector<8x384xf32> -> vector<8x384xf32>
    %195 = vector.extract_strided_slice %192 {offsets = [0, 0], sizes = [8, 128], strides = [1, 1]} : vector<8x384xf32> to vector<8x128xf32>
    %196 = vector.extract_strided_slice %194 {offsets = [0, 0], sizes = [8, 128], strides = [1, 1]} : vector<8x384xf32> to vector<8x128xf32>
    %197 = arith.addf %195, %196 : vector<8x128xf32>
    %198 = arith.negf %197 : vector<8x128xf32>
    %199 = math.exp %198 : vector<8x128xf32>
    %cst_43 = arith.constant 1.000000e+00 : f32
    %200 = vector.broadcast %cst_43 : f32 to vector<8x128xf32>
    %201 = arith.addf %200, %199 : vector<8x128xf32>
    %202 = arith.divf %200, %201 : vector<8x128xf32>
    %203 = vector.extract_strided_slice %192 {offsets = [0, 128], sizes = [8, 128], strides = [1, 1]} : vector<8x384xf32> to vector<8x128xf32>
    %204 = vector.extract_strided_slice %194 {offsets = [0, 128], sizes = [8, 128], strides = [1, 1]} : vector<8x384xf32> to vector<8x128xf32>
    %205 = arith.addf %203, %204 : vector<8x128xf32>
    %206 = arith.negf %205 : vector<8x128xf32>
    %207 = math.exp %206 : vector<8x128xf32>
    %cst_44 = arith.constant 1.000000e+00 : f32
    %208 = vector.broadcast %cst_44 : f32 to vector<8x128xf32>
    %209 = arith.addf %208, %207 : vector<8x128xf32>
    %210 = arith.divf %208, %209 : vector<8x128xf32>
    %211 = vector.extract_strided_slice %192 {offsets = [0, 256], sizes = [8, 128], strides = [1, 1]} : vector<8x384xf32> to vector<8x128xf32>
    %212 = vector.extract_strided_slice %194 {offsets = [0, 256], sizes = [8, 128], strides = [1, 1]} : vector<8x384xf32> to vector<8x128xf32>
    %213 = arith.addf %212, %3 : vector<8x128xf32>
    %214 = arith.mulf %202, %213 : vector<8x128xf32>
    %215 = arith.addf %211, %214 : vector<8x128xf32>
    %216 = math.tanh %215 : vector<8x128xf32>
    %cst_45 = arith.constant 1.000000e+00 : f32
    %217 = vector.broadcast %cst_45 : f32 to vector<8x128xf32>
    %218 = arith.subf %217, %210 : vector<8x128xf32>
    %219 = arith.mulf %218, %216 : vector<8x128xf32>
    %220 = arith.mulf %210, %190 : vector<8x128xf32>
    %221 = arith.addf %219, %220 : vector<8x128xf32>
    %c7 = arith.constant 7 : index
    %c0_46 = arith.constant 0 : index
    %c0_47 = arith.constant 0 : index
    %222 = vector.load %arg0[%c7, %c0_46, %c0_47] : memref<8x8x384xf32, #tpu.memory_space<vmem>>, vector<1x8x384xf32>
    %223 = vector.shape_cast %222 : vector<1x8x384xf32> to vector<8x384xf32>
    %224 = arith.truncf %221 : vector<8x128xf32> to vector<8x128xbf16>
    %cst_48 = arith.constant dense<0.000000e+00> : vector<8x384xf32>
    %225 = tpu.matmul %224, %0, %cst_48 {dimension_numbers = #tpu.dot_dimension_numbers<[1], [0], [0], [1], [0, 0, 1, 1], [], []>} : vector<8x128xbf16>, vector<128x384xbf16>, vector<8x384xf32> -> vector<8x384xf32>
    %226 = vector.extract_strided_slice %223 {offsets = [0, 0], sizes = [8, 128], strides = [1, 1]} : vector<8x384xf32> to vector<8x128xf32>
    %227 = vector.extract_strided_slice %225 {offsets = [0, 0], sizes = [8, 128], strides = [1, 1]} : vector<8x384xf32> to vector<8x128xf32>
    %228 = arith.addf %226, %227 : vector<8x128xf32>
    %229 = arith.negf %228 : vector<8x128xf32>
    %230 = math.exp %229 : vector<8x128xf32>
    %cst_49 = arith.constant 1.000000e+00 : f32
    %231 = vector.broadcast %cst_49 : f32 to vector<8x128xf32>
    %232 = arith.addf %231, %230 : vector<8x128xf32>
    %233 = arith.divf %231, %232 : vector<8x128xf32>
    %234 = vector.extract_strided_slice %223 {offsets = [0, 128], sizes = [8, 128], strides = [1, 1]} : vector<8x384xf32> to vector<8x128xf32>
    %235 = vector.extract_strided_slice %225 {offsets = [0, 128], sizes = [8, 128], strides = [1, 1]} : vector<8x384xf32> to vector<8x128xf32>
    %236 = arith.addf %234, %235 : vector<8x128xf32>
    %237 = arith.negf %236 : vector<8x128xf32>
    %238 = math.exp %237 : vector<8x128xf32>
    %cst_50 = arith.constant 1.000000e+00 : f32
    %239 = vector.broadcast %cst_50 : f32 to vector<8x128xf32>
    %240 = arith.addf %239, %238 : vector<8x128xf32>
    %241 = arith.divf %239, %240 : vector<8x128xf32>
    %242 = vector.extract_strided_slice %223 {offsets = [0, 256], sizes = [8, 128], strides = [1, 1]} : vector<8x384xf32> to vector<8x128xf32>
    %243 = vector.extract_strided_slice %225 {offsets = [0, 256], sizes = [8, 128], strides = [1, 1]} : vector<8x384xf32> to vector<8x128xf32>
    %244 = arith.addf %243, %3 : vector<8x128xf32>
    %245 = arith.mulf %233, %244 : vector<8x128xf32>
    %246 = arith.addf %242, %245 : vector<8x128xf32>
    %247 = math.tanh %246 : vector<8x128xf32>
    %cst_51 = arith.constant 1.000000e+00 : f32
    %248 = vector.broadcast %cst_51 : f32 to vector<8x128xf32>
    %249 = arith.subf %248, %241 : vector<8x128xf32>
    %250 = arith.mulf %249, %247 : vector<8x128xf32>
    %251 = arith.mulf %241, %221 : vector<8x128xf32>
    %252 = arith.addf %250, %251 : vector<8x128xf32>
    %253 = tpu.iota {dimensions = array<i32: 1>} : vector<8x128xi32>
    %c32_i32 = arith.constant 32 : i32
    %254 = vector.broadcast %c32_i32 : i32 to vector<8x128xi32>
    %255 = arith.cmpi slt, %253, %254 : vector<8x128xi32>
    %256 = arith.select %255, %35, %252 : vector<8x128xi1>, vector<8x128xf32>
    %257 = arith.select %255, %66, %221 : vector<8x128xi1>, vector<8x128xf32>
    %258 = arith.select %255, %97, %190 : vector<8x128xi1>, vector<8x128xf32>
    %259 = arith.select %255, %128, %159 : vector<8x128xi1>, vector<8x128xf32>
    %260 = arith.select %255, %159, %128 : vector<8x128xi1>, vector<8x128xf32>
    %261 = arith.select %255, %190, %97 : vector<8x128xi1>, vector<8x128xf32>
    %262 = arith.select %255, %221, %66 : vector<8x128xi1>, vector<8x128xf32>
    %263 = arith.select %255, %252, %35 : vector<8x128xi1>, vector<8x128xf32>
    %264 = arith.mulf %256, %252 : vector<8x128xf32>
    %cst_52 = arith.constant dense<0.000000e+00> : vector<8xf32>
    %265 = vector.multi_reduction <add>, %264, %cst_52 [1] : vector<8x128xf32> to vector<8xf32>
    %266 = vector.shape_cast %265 : vector<8xf32> to vector<8x1xf32>
    %267 = arith.mulf %257, %252 : vector<8x128xf32>
    %cst_53 = arith.constant dense<0.000000e+00> : vector<8xf32>
    %268 = vector.multi_reduction <add>, %267, %cst_53 [1] : vector<8x128xf32> to vector<8xf32>
    %269 = vector.shape_cast %268 : vector<8xf32> to vector<8x1xf32>
    %270 = arith.mulf %258, %252 : vector<8x128xf32>
    %cst_54 = arith.constant dense<0.000000e+00> : vector<8xf32>
    %271 = vector.multi_reduction <add>, %270, %cst_54 [1] : vector<8x128xf32> to vector<8xf32>
    %272 = vector.shape_cast %271 : vector<8xf32> to vector<8x1xf32>
    %273 = arith.mulf %259, %252 : vector<8x128xf32>
    %cst_55 = arith.constant dense<0.000000e+00> : vector<8xf32>
    %274 = vector.multi_reduction <add>, %273, %cst_55 [1] : vector<8x128xf32> to vector<8xf32>
    %275 = vector.shape_cast %274 : vector<8xf32> to vector<8x1xf32>
    %276 = arith.mulf %260, %252 : vector<8x128xf32>
    %cst_56 = arith.constant dense<0.000000e+00> : vector<8xf32>
    %277 = vector.multi_reduction <add>, %276, %cst_56 [1] : vector<8x128xf32> to vector<8xf32>
    %278 = vector.shape_cast %277 : vector<8xf32> to vector<8x1xf32>
    %279 = arith.mulf %261, %252 : vector<8x128xf32>
    %cst_57 = arith.constant dense<0.000000e+00> : vector<8xf32>
    %280 = vector.multi_reduction <add>, %279, %cst_57 [1] : vector<8x128xf32> to vector<8xf32>
    %281 = vector.shape_cast %280 : vector<8xf32> to vector<8x1xf32>
    %282 = arith.mulf %262, %252 : vector<8x128xf32>
    %cst_58 = arith.constant dense<0.000000e+00> : vector<8xf32>
    %283 = vector.multi_reduction <add>, %282, %cst_58 [1] : vector<8x128xf32> to vector<8xf32>
    %284 = vector.shape_cast %283 : vector<8xf32> to vector<8x1xf32>
    %285 = arith.mulf %263, %252 : vector<8x128xf32>
    %cst_59 = arith.constant dense<0.000000e+00> : vector<8xf32>
    %286 = vector.multi_reduction <add>, %285, %cst_59 [1] : vector<8x128xf32> to vector<8xf32>
    %287 = vector.shape_cast %286 : vector<8xf32> to vector<8x1xf32>
    %288 = arith.maximumf %266, %269 : vector<8x1xf32>
    %289 = arith.maximumf %288, %272 : vector<8x1xf32>
    %290 = arith.maximumf %289, %275 : vector<8x1xf32>
    %291 = arith.maximumf %290, %278 : vector<8x1xf32>
    %292 = arith.maximumf %291, %281 : vector<8x1xf32>
    %293 = arith.maximumf %292, %284 : vector<8x1xf32>
    %294 = arith.maximumf %293, %287 : vector<8x1xf32>
    %295 = arith.subf %266, %294 : vector<8x1xf32>
    %296 = math.exp %295 : vector<8x1xf32>
    %297 = arith.subf %269, %294 : vector<8x1xf32>
    %298 = math.exp %297 : vector<8x1xf32>
    %299 = arith.subf %272, %294 : vector<8x1xf32>
    %300 = math.exp %299 : vector<8x1xf32>
    %301 = arith.subf %275, %294 : vector<8x1xf32>
    %302 = math.exp %301 : vector<8x1xf32>
    %303 = arith.subf %278, %294 : vector<8x1xf32>
    %304 = math.exp %303 : vector<8x1xf32>
    %305 = arith.subf %281, %294 : vector<8x1xf32>
    %306 = math.exp %305 : vector<8x1xf32>
    %307 = arith.subf %284, %294 : vector<8x1xf32>
    %308 = math.exp %307 : vector<8x1xf32>
    %309 = arith.subf %287, %294 : vector<8x1xf32>
    %310 = math.exp %309 : vector<8x1xf32>
    %311 = arith.addf %296, %298 : vector<8x1xf32>
    %312 = arith.addf %311, %300 : vector<8x1xf32>
    %313 = arith.addf %312, %302 : vector<8x1xf32>
    %314 = arith.addf %313, %304 : vector<8x1xf32>
    %315 = arith.addf %314, %306 : vector<8x1xf32>
    %316 = arith.addf %315, %308 : vector<8x1xf32>
    %317 = arith.addf %316, %310 : vector<8x1xf32>
    %cst_60 = arith.constant 1.000000e+00 : f32
    %318 = vector.broadcast %cst_60 : f32 to vector<8x1xf32>
    %319 = arith.divf %318, %317 : vector<8x1xf32>
    %320 = arith.mulf %296, %319 : vector<8x1xf32>
    %321 = vector.broadcast %320 : vector<8x1xf32> to vector<8x128xf32>
    %322 = arith.mulf %256, %321 : vector<8x128xf32>
    %323 = arith.mulf %298, %319 : vector<8x1xf32>
    %324 = vector.broadcast %323 : vector<8x1xf32> to vector<8x128xf32>
    %325 = arith.mulf %257, %324 : vector<8x128xf32>
    %326 = arith.addf %322, %325 : vector<8x128xf32>
    %327 = arith.addf %256, %257 : vector<8x128xf32>
    %328 = arith.maximumf %256, %257 : vector<8x128xf32>
    %329 = arith.mulf %300, %319 : vector<8x1xf32>
    %330 = vector.broadcast %329 : vector<8x1xf32> to vector<8x128xf32>
    %331 = arith.mulf %258, %330 : vector<8x128xf32>
    %332 = arith.addf %326, %331 : vector<8x128xf32>
    %333 = arith.addf %327, %258 : vector<8x128xf32>
    %334 = arith.maximumf %328, %258 : vector<8x128xf32>
    %335 = arith.mulf %302, %319 : vector<8x1xf32>
    %336 = vector.broadcast %335 : vector<8x1xf32> to vector<8x128xf32>
    %337 = arith.mulf %259, %336 : vector<8x128xf32>
    %338 = arith.addf %332, %337 : vector<8x128xf32>
    %339 = arith.addf %333, %259 : vector<8x128xf32>
    %340 = arith.maximumf %334, %259 : vector<8x128xf32>
    %341 = arith.mulf %304, %319 : vector<8x1xf32>
    %342 = vector.broadcast %341 : vector<8x1xf32> to vector<8x128xf32>
    %343 = arith.mulf %260, %342 : vector<8x128xf32>
    %344 = arith.addf %338, %343 : vector<8x128xf32>
    %345 = arith.addf %339, %260 : vector<8x128xf32>
    %346 = arith.maximumf %340, %260 : vector<8x128xf32>
    %347 = arith.mulf %306, %319 : vector<8x1xf32>
    %348 = vector.broadcast %347 : vector<8x1xf32> to vector<8x128xf32>
    %349 = arith.mulf %261, %348 : vector<8x128xf32>
    %350 = arith.addf %344, %349 : vector<8x128xf32>
    %351 = arith.addf %345, %261 : vector<8x128xf32>
    %352 = arith.maximumf %346, %261 : vector<8x128xf32>
    %353 = arith.mulf %308, %319 : vector<8x1xf32>
    %354 = vector.broadcast %353 : vector<8x1xf32> to vector<8x128xf32>
    %355 = arith.mulf %262, %354 : vector<8x128xf32>
    %356 = arith.addf %350, %355 : vector<8x128xf32>
    %357 = arith.addf %351, %262 : vector<8x128xf32>
    %358 = arith.maximumf %352, %262 : vector<8x128xf32>
    %359 = arith.mulf %310, %319 : vector<8x1xf32>
    %360 = vector.broadcast %359 : vector<8x1xf32> to vector<8x128xf32>
    %361 = arith.mulf %263, %360 : vector<8x128xf32>
    %362 = arith.addf %356, %361 : vector<8x128xf32>
    %363 = arith.addf %357, %263 : vector<8x128xf32>
    %364 = arith.maximumf %358, %263 : vector<8x128xf32>
    %cst_61 = arith.constant 1.250000e-01 : f32
    %365 = vector.broadcast %cst_61 : f32 to vector<8x128xf32>
    %366 = arith.mulf %363, %365 : vector<8x128xf32>
    %c0_62 = arith.constant 0 : index
    %c0_63 = arith.constant 0 : index
    %367 = vector.load %arg3[%c0_62, %c0_63] : memref<2x384xf32, #tpu.memory_space<vmem>>, vector<2x384xf32>
    %368 = vector.shape_cast %366 : vector<8x128xf32> to vector<8x1x128xf32>
    %369 = vector.extract_strided_slice %367 {offsets = [0, 0], sizes = [2, 128], strides = [1, 1]} : vector<2x384xf32> to vector<2x128xf32>
    %370 = vector.shape_cast %369 : vector<2x128xf32> to vector<1x2x128xf32>
    %371 = vector.broadcast %368 : vector<8x1x128xf32> to vector<8x2x128xf32>
    %372 = vector.broadcast %370 : vector<1x2x128xf32> to vector<8x2x128xf32>
    %373 = arith.mulf %371, %372 : vector<8x2x128xf32>
    %374 = vector.shape_cast %364 : vector<8x128xf32> to vector<8x1x128xf32>
    %375 = vector.extract_strided_slice %367 {offsets = [0, 128], sizes = [2, 128], strides = [1, 1]} : vector<2x384xf32> to vector<2x128xf32>
    %376 = vector.shape_cast %375 : vector<2x128xf32> to vector<1x2x128xf32>
    %377 = vector.broadcast %374 : vector<8x1x128xf32> to vector<8x2x128xf32>
    %378 = vector.broadcast %376 : vector<1x2x128xf32> to vector<8x2x128xf32>
    %379 = arith.mulf %377, %378 : vector<8x2x128xf32>
    %380 = arith.addf %373, %379 : vector<8x2x128xf32>
    %381 = vector.shape_cast %362 : vector<8x128xf32> to vector<8x1x128xf32>
    %382 = vector.extract_strided_slice %367 {offsets = [0, 256], sizes = [2, 128], strides = [1, 1]} : vector<2x384xf32> to vector<2x128xf32>
    %383 = vector.shape_cast %382 : vector<2x128xf32> to vector<1x2x128xf32>
    %384 = vector.broadcast %381 : vector<8x1x128xf32> to vector<8x2x128xf32>
    %385 = vector.broadcast %383 : vector<1x2x128xf32> to vector<8x2x128xf32>
    %386 = arith.mulf %384, %385 : vector<8x2x128xf32>
    %387 = arith.addf %380, %386 : vector<8x2x128xf32>
    %cst_64 = arith.constant dense<0.000000e+00> : vector<8x2xf32>
    %388 = vector.multi_reduction <add>, %387, %cst_64 [2] : vector<8x2x128xf32> to vector<8x2xf32>
    %c0_65 = arith.constant 0 : index
    %c0_66 = arith.constant 0 : index
    %389 = vector.load %arg4[%c0_65, %c0_66] : memref<1x2xf32, #tpu.memory_space<vmem>>, vector<1x2xf32>
    %390 = vector.broadcast %389 : vector<1x2xf32> to vector<8x2xf32>
    %391 = arith.addf %388, %390 : vector<8x2xf32>
    %c0_67 = arith.constant 0 : index
    %c0_68 = arith.constant 0 : index
    %392 = vector.load %arg5[%c0_67, %c0_68] : memref<8x2xf32, #tpu.memory_space<vmem>>, vector<8x2xf32>
    tpu.vector_store %arg5[%c0_67, %c0_68], %391 {strides = array<i32>} : memref<8x2xf32, #tpu.memory_space<vmem>>, vector<8x2xf32>,
    return
  }
}

</mosaic_0001>

<bundles_post_ra>
// kernel: gru_attn_forward.1
= control target key start
LH: loop header
LB: loop body
LE: loop exit
PB: predicated region body
PF: predicated region fallthrough
CT: control target
= control target key end

     0   :  { %v2042_v1 = vmov 0.0   ;;  %v2043_v2 = vmov 0   ;;  %vm2044_vm0 = vmmov 0   ;;  %vm1479_vm2 = vcmask 1041408   ;;  %s2775_s1 = inlined_call_operand.vmem [shape: bf16[128,384], index: 1, kind: input, shape index: {}]   ;;  %s2776_s0 = inlined_call_operand.vmem [shape: f32[8,8,384], index: 0, kind: input, shape index: {}]   ;;  %s2777_s2 = inlined_call_operand.vmem [shape: f32[1,128], index: 2, kind: input, shape index: {}]   ;;  %s2778_s3 = inlined_call_operand.vmem [shape: f32[2,384], index: 3, kind: input, shape index: {}]   ;;  %s2779_s4 = inlined_call_operand.vmem [shape: f32[1,2], index: 4, kind: input, shape index: {}]   ;;  %s2780_s5 = inlined_call_operand.vmem [shape: f32[8,2], index: 5, kind: output, shape index: {}]  }
   0x1   :  { %v2079_v0 = vld [vmem:[%s2775_s1 + $0xac] ss:$12 sps:$4 sm:$0xff]   ;;  %1742 = vmatprep.subr.bf16.mxu1 %v2042_v1  ;;  %223 = vmatprep.mubr.bf16.mxu0 %v2043_v2  ;;  %v2086_v3 = vld [vmem:[%s2775_s1 + $0xa8] ss:$12 sps:$4 sm:$0xff]   ;;  %v2102_v5 = vld [vmem:[%s2775_s1 + $0x90] ss:$12 sps:$4 sm:$0xff]  }
   0x2   :  { %1758 = vmatprep.mubr.msk.bf16.mxu1 %vm2044_vm0, %v2042_v1  ;;  %1907 = vset.pattern.permute.xlu0 %v2043_v2  ;;  %v2095_v4 = vld [vmem:[%s2775_s1 + $0x94] ss:$12 sps:$4 sm:$0xff]   ;;  %v2108_v6 = vld [vmem:[%s2775_s1 + $0x7c] ss:$12 sps:$4 sm:$0xff]   ;;  %v2114_v7 = vld [vmem:[%s2775_s1 + $0x78] ss:$12 sps:$4 sm:$0xff]  }
   0x3   :  { %191 = vmatprep.subr.bf16.mxu0 %v2079_v0  ;;  %1906 = vset.pattern.permute.xlu1 %v2043_v2  ;;  %v2120_v8 = vld [vmem:[%s2775_s1 + $0x64] ss:$12 sps:$4 sm:$0xff]   ;;  %v2131_v10 = vld [vmem:[%s2775_s1 + $0x60] ss:$12 sps:$4 sm:$0xff]   ;;  %v2149_v13 = vld [vmem:[%s2775_s1 + $0x48] ss:$12 sps:$4 sm:$0xff]  }
   0x4   :  { %192 = vmatpush1.bf16.msra.mxu0 %v2086_v3  ;;  %v2125_v9 = vld [vmem:[%s2775_s1 + $0xb0] ss:$12 sps:$4 sm:$0xff]   ;;  %v2136_v11 = vld [vmem:[%s2775_s1 + $0x4c] ss:$12 sps:$4 sm:$0xff]   ;;  %v2155_v14 = vld [vmem:[%s2775_s1 + $0x34] ss:$12 sps:$4 sm:$0xff]  }
   0x5   :  { %193 = vmatprep.subr.bf16.mxu0 %v2095_v4  ;;  %1743 = vmatpush3.bf16.msra.mxu1 %v2125_v9  ;;  %v2143_v12 = vld [vmem:[%s2775_s1 + $0x98] ss:$12 sps:$4 sm:$0xff]   ;;  %v2162_v15 = vld [vmem:[%s2775_s1 + $0x80] ss:$12 sps:$4 sm:$0xff]   ;;  %v2169_v16 = vld [vmem:[%s2775_s1 + $0x30] ss:$12 sps:$4 sm:$0xff]  }
   0x6   :  { %1744 = vmatprep.subr.bf16.mxu1 %v2042_v1  ;;  %v2175_v17 = vld [vmem:[%s2775_s1 + $0x1c] ss:$12 sps:$4 sm:$0xff]   ;;  %v2188_v19 = vld [vmem:[%s2775_s1 + $0x18] ss:$12 sps:$4 sm:$0xff]   ;;  %v2207_v22 = vld [vmem:[%s2775_s1] ss:$12 sps:$4 sm:$0xff]  }
   0x7   :  { %v2181_v18 = vld [vmem:[%s2775_s1 + $0x68] ss:$12 sps:$4 sm:$0xff]   ;;  %v2194_v20 = vld [vmem:[%s2775_s1 + $0x4] ss:$12 sps:$4 sm:$0xff]   ;;  %v2222_v24 = vld [vmem:[%s2775_s1 + $0x20] ss:$12 sps:$4 sm:$0xff]  }
   0x8   :  { %194 = vmatpush1.bf16.msra.mxu0 %v2102_v5  ;;  %v2200_v21 = vld [vmem:[%s2775_s1 + $0x50] ss:$12 sps:$4 sm:$0xff]   ;;  %v2214_v23 = vld [vmem:[%s2775_s1 + $0x38] ss:$12 sps:$4 sm:$0xff]   ;;  %v2233_v25 = vld [vmem:[%s2775_s1 + $0x8] ss:$12 sps:$4 sm:$0xff]  }
   0x9   :  { %195 = vmatprep.subr.bf16.mxu0 %v2108_v6  ;;  %1745 = vmatpush3.bf16.msra.mxu1 %v2143_v12  ;;  %v60_v26 = vld [vmem:[%s2776_s0] sm:$0xff]  ;;  %v61_v31 = vld [vmem:[%s2776_s0 + $0x8] sm:$0xff]  ;;  %v62_v47 = vld [vmem:[%s2776_s0 + $0x10] sm:$0xff]  ;;  %vm1586_vm3 = vcmask 1041409   ;;  %vm1588_vm4 = vcmask 1042434   ;;  %vm1590_vm5 = vcmask 1043459  }
   0xa   :  { %1746 = vmatprep.subr.bf16.mxu1 %v2042_v1  ;;  %v2281_v43 = vld [vmem:[%s2777_s2] ss:$0 sm:$0xff]  ;;  %v1634_v57 = vld [vmem:[%s2776_s0 + $0x18] sm:$0xff]  ;;  %vm1592_vm6 = vcmask 1044484   ;;  %vm1594_vm7 = vcmask 1045509   ;;  %vm1596_vm8 = vcmask 1046534  }
   0xb   :  { %vm1598_vm9 = vcmask 1047559   ;;  %vm1601_vm10 = vcmask 15360  }
   0xc   :  { %196 = vmatpush1.bf16.msra.mxu0 %v2114_v7 }
   0xd   :  { %197 = vmatprep.subr.bf16.mxu0 %v2120_v8  ;;  %1747 = vmatpush3.bf16.msra.mxu1 %v2162_v15 }
   0xe   :  { %1748 = vmatprep.subr.bf16.mxu1 %v2042_v1 }
  0x10   :  { %198 = vmatpush1.bf16.msra.mxu0 %v2131_v10 }
  0x11   :  { %199 = vmatprep.subr.bf16.mxu0 %v2136_v11  ;;  %1749 = vmatpush3.bf16.msra.mxu1 %v2181_v18 }
  0x12   :  { %1750 = vmatprep.subr.bf16.mxu1 %v2042_v1 }
  0x14   :  { %200 = vmatpush1.bf16.msra.mxu0 %v2149_v13 }
  0x15   :  { %201 = vmatprep.subr.bf16.mxu0 %v2155_v14  ;;  %1751 = vmatpush3.bf16.msra.mxu1 %v2200_v21 }
  0x16   :  { %1752 = vmatprep.subr.bf16.mxu1 %v2042_v1 }
  0x18   :  { %202 = vmatpush1.bf16.msra.mxu0 %v2169_v16 }
  0x19   :  { %203 = vmatprep.subr.bf16.mxu0 %v2175_v17  ;;  %1753 = vmatpush3.bf16.msra.mxu1 %v2214_v23 }
  0x1a   :  { %1754 = vmatprep.subr.bf16.mxu1 %v2042_v1 }
  0x1c   :  { %204 = vmatpush1.bf16.msra.mxu0 %v2188_v19 }
  0x1d   :  { %205 = vmatprep.subr.bf16.mxu0 %v2194_v20  ;;  %1755 = vmatpush3.bf16.msra.mxu1 %v2222_v24 }
  0x1e   :  { %1756 = vmatprep.subr.bf16.mxu1 %v2042_v1 }
  0x20   :  { %206 = vmatpush1.bf16.msra.mxu0 %v2207_v22 }
  0x21   :  { %299 = vmatprep.subr.bf16.mxu0 %v2079_v0  ;;  %1757 = vmatpush3.bf16.msra.mxu1 %v2233_v25 }
  0x22   :  { %1762 = vmatprep.subr.bf16.mxu1 %v2042_v1 }
  0x23   :  { %224 = vmatmul.mubr.bf16.vlgmr.msra.gmra.mxu0 %v2043_v2 }
  0x24   :  { %300 = vmatpush1.bf16.msra.mxu0 %v2086_v3  ;;  %331 = vmatprep.mubr.bf16.mxu0 %v2043_v2 }
  0x25   :  { %301 = vmatprep.subr.bf16.mxu0 %v2095_v4  ;;  %1759 = vmatmul.mubr.bf16.vlgmr.msra.gmra.mxu1 %v2043_v2 }
  0x26   :  { %1763 = vmatpush3.bf16.msra.mxu1 %v2125_v9  ;;  %1778 = vmatprep.mubr.msk.bf16.mxu1 %vm2044_vm0, %v2042_v1 }
  0x27   :  { %1764 = vmatprep.subr.bf16.mxu1 %v2042_v1 }
  0x28   :  { %302 = vmatpush1.bf16.msra.mxu0 %v2102_v5 }
  0x29   :  { %303 = vmatprep.subr.bf16.mxu0 %v2108_v6 }
  0x2a   :  { %1765 = vmatpush3.bf16.msra.mxu1 %v2143_v12 }
  0x2b   :  { %1766 = vmatprep.subr.bf16.mxu1 %v2042_v1 }
  0x2c   :  { %304 = vmatpush1.bf16.msra.mxu0 %v2114_v7 }
  0x2d   :  { %305 = vmatprep.subr.bf16.mxu0 %v2120_v8 }
  0x2e   :  { %1767 = vmatpush3.bf16.msra.mxu1 %v2162_v15 }
  0x2f   :  { %1768 = vmatprep.subr.bf16.mxu1 %v2042_v1 }
  0x30   :  { %306 = vmatpush1.bf16.msra.mxu0 %v2131_v10 }
  0x31   :  { %307 = vmatprep.subr.bf16.mxu0 %v2136_v11 }
  0x32   :  { %1769 = vmatpush3.bf16.msra.mxu1 %v2181_v18 }
  0x33   :  { %1770 = vmatprep.subr.bf16.mxu1 %v2042_v1 }
  0x34   :  { %308 = vmatpush1.bf16.msra.mxu0 %v2149_v13 }
  0x35   :  { %309 = vmatprep.subr.bf16.mxu0 %v2155_v14 }
  0x36   :  { %1771 = vmatpush3.bf16.msra.mxu1 %v2200_v21 }
  0x37   :  { %1772 = vmatprep.subr.bf16.mxu1 %v2042_v1 }
  0x38   :  { %310 = vmatpush1.bf16.msra.mxu0 %v2169_v16 }
  0x39   :  { %311 = vmatprep.subr.bf16.mxu0 %v2175_v17 }
  0x3a   :  { %1773 = vmatpush3.bf16.msra.mxu1 %v2214_v23 }
  0x3b   :  { %1774 = vmatprep.subr.bf16.mxu1 %v2042_v1 }
  0x3c   :  { %312 = vmatpush1.bf16.msra.mxu0 %v2188_v19 }
  0x3d   :  { %313 = vmatprep.subr.bf16.mxu0 %v2194_v20 }
  0x3e   :  { %1775 = vmatpush3.bf16.msra.mxu1 %v2222_v24 }
  0x3f   :  { %1776 = vmatprep.subr.bf16.mxu1 %v2042_v1 }
  0x40   :  { %314 = vmatpush1.bf16.msra.mxu0 %v2207_v22 }
  0x41   :  { %407 = vmatprep.subr.bf16.mxu0 %v2079_v0 }
  0x42   :  { %1777 = vmatpush3.bf16.msra.mxu1 %v2233_v25 }
  0x43   :  { %1782 = vmatprep.subr.bf16.mxu1 %v2042_v1 }
  0xe3   :  { %v225_v27 = vpop.f32.mrf.mxu0 }
  0xe4   :  { %v272_v28 = vadd.f32 %v225_v27, %v60_v26  ;;  %v1635_v26 = vld [vmem:[%s2776_s0 + $0x20] sm:$0xff] }
  0xe5   :  { %v227_v29 = vpop.f32.mrf.mxu0  ;;  %v266_v35 = vpop.f32.mrf.mxu1 }
  0xe6   :  { %v1632_v30 = vmul.f32 -1.442695, %v272_v28  ;;  %v279_v34 = vadd.f32 %v227_v29, %v61_v31  ;;  %v286_v45 = vadd.f32 %v2281_v43, %v266_v35 }
  0xe7   :  { %v229_v32 = vpop.f32.mrf.mxu0  ;;  %v1760_v37 = vpop.f32.mrf.mxu1 }
  0xe8   :  { %1940 = vpow2.f32 %v1632_v30  ;;  %v1633_v36 = vmul.f32 -1.442695, %v279_v34 }
  0xe9   :  { %v230_v33 = vpop.f32.mrf.mxu0  ;;  %v269_v38 = vpop.f32.mrf.mxu1 }
  0xea   :  { %1942 = vpow2.f32 %v1633_v36 }
  0xeb   :  { %v1761_v39 = vpop.f32.mrf.mxu1 }
  0xec   :  { %v1636_v39 = vld [vmem:[%s2776_s0 + $0x28] sm:$0xff] }
  0xf5   :  { %v1941_v40 = vpop.eup %1940 }
  0xf6   :  { %v276_v41 = vadd.f32 1.0, %v1941_v40 }
  0xf7   :  { %v1943_v42 = vpop.eup %1942 }
  0xf8   :  { %1944 = vrcp.f32 %v276_v41  ;;  %v283_v44 = vadd.f32 1.0, %v1943_v42 }
  0xfa   :  { %1946 = vrcp.f32 %v283_v44 }
 0x105   :  { %v1945_v46 = vpop.eup %1944 }
 0x106   :  { %v287_v48 = vmul.f32 %v1945_v46, %v286_v45 }
 0x107   :  { %v1947_v50 = vpop.eup %1946 }
 0x108   :  { %v288_v49 = vadd.f32 %v287_v48, %v62_v47  ;;  %v290_v51 = vsub.f32 1.0, %v1947_v50  ;;  %v292_v54 = vmul.f32 0.0, %v1947_v50  ;;  %v1639_v50 = vld [vmem:[%s2776_s0 + $0x30] sm:$0xff] }
 0x10a   :  { %1948 = vtanh.f32 %v288_v49 }
 0x117   :  { %v1949_v52 = vpop.eup %1948 }
 0x118   :  { %v291_v53 = vmul.f32 %v1949_v52, %v290_v51 }
 0x11a   :  { %v2287_v55 = vadd.f32 %v292_v54, %v291_v53 }
 0x11c   :  { %v298_v56 = vpack.c.bf16 %v2287_v55, %v2287_v55 }
 0x11e   :  { %332 = vmatmul.mubr.bf16.vlgmr.msra.gmra.mxu0 %v298_v56  ;;  %1779 = vmatmul.mubr.bf16.vlgmr.msra.gmra.mxu1 %v298_v56 }
 0x11f   :  { %408 = vmatpush1.bf16.msra.mxu0 %v2086_v3  ;;  %1783 = vmatpush3.bf16.msra.mxu1 %v2125_v9 }
 0x120   :  { %409 = vmatprep.subr.bf16.mxu0 %v2095_v4  ;;  %1784 = vmatprep.subr.bf16.mxu1 %v2042_v1 }
 0x121   :  { %439 = vmatprep.mubr.bf16.mxu0 %v2043_v2  ;;  %1798 = vmatprep.mubr.msk.bf16.mxu1 %vm2044_vm0, %v2042_v1 }
 0x123   :  { %410 = vmatpush1.bf16.msra.mxu0 %v2102_v5  ;;  %1785 = vmatpush3.bf16.msra.mxu1 %v2143_v12 }
 0x124   :  { %411 = vmatprep.subr.bf16.mxu0 %v2108_v6  ;;  %1786 = vmatprep.subr.bf16.mxu1 %v2042_v1 }
 0x127   :  { %412 = vmatpush1.bf16.msra.mxu0 %v2114_v7  ;;  %1787 = vmatpush3.bf16.msra.mxu1 %v2162_v15 }
 0x128   :  { %413 = vmatprep.subr.bf16.mxu0 %v2120_v8  ;;  %1788 = vmatprep.subr.bf16.mxu1 %v2042_v1 }
 0x12b   :  { %414 = vmatpush1.bf16.msra.mxu0 %v2131_v10  ;;  %1789 = vmatpush3.bf16.msra.mxu1 %v2181_v18 }
 0x12c   :  { %415 = vmatprep.subr.bf16.mxu0 %v2136_v11  ;;  %1790 = vmatprep.subr.bf16.mxu1 %v2042_v1 }
 0x12f   :  { %416 = vmatpush1.bf16.msra.mxu0 %v2149_v13  ;;  %1791 = vmatpush3.bf16.msra.mxu1 %v2200_v21 }
 0x130   :  { %417 = vmatprep.subr.bf16.mxu0 %v2155_v14  ;;  %1792 = vmatprep.subr.bf16.mxu1 %v2042_v1 }
 0x133   :  { %418 = vmatpush1.bf16.msra.mxu0 %v2169_v16  ;;  %1793 = vmatpush3.bf16.msra.mxu1 %v2214_v23 }
 0x134   :  { %419 = vmatprep.subr.bf16.mxu0 %v2175_v17  ;;  %1794 = vmatprep.subr.bf16.mxu1 %v2042_v1 }
 0x137   :  { %420 = vmatpush1.bf16.msra.mxu0 %v2188_v19  ;;  %1795 = vmatpush3.bf16.msra.mxu1 %v2222_v24 }
 0x138   :  { %421 = vmatprep.subr.bf16.mxu0 %v2194_v20  ;;  %1796 = vmatprep.subr.bf16.mxu1 %v2042_v1 }
 0x13b   :  { %422 = vmatpush1.bf16.msra.mxu0 %v2207_v22  ;;  %1797 = vmatpush3.bf16.msra.mxu1 %v2233_v25 }
 0x13c   :  { %515 = vmatprep.subr.bf16.mxu0 %v2079_v0  ;;  %1802 = vmatprep.subr.bf16.mxu1 %v2042_v1 }
 0x1de   :  { %v333_v58 = vpop.f32.mrf.mxu0  ;;  %v374_v59 = vpop.f32.mrf.mxu1 }
 0x1df   :  { %v380_v60 = vadd.f32 %v1634_v57, %v333_v58  ;;  %v394_v37 = vadd.f32 %v2281_v43, %v374_v59  ;;  %v1640_v58 = vld [vmem:[%s2776_s0 + $0x38] sm:$0xff] }
 0x1e0   :  { %v335_v61 = vpop.f32.mrf.mxu0  ;;  %v1780_v62 = vpop.f32.mrf.mxu1 }
 0x1e1   :  { %v1637_v63 = vmul.f32 -1.442695, %v380_v60  ;;  %v387_v31 = vadd.f32 %v1635_v26, %v335_v61 }
 0x1e2   :  { %v337_v27 = vpop.f32.mrf.mxu0  ;;  %v377_v28 = vpop.f32.mrf.mxu1 }
 0x1e3   :  { %1950 = vpow2.f32 %v1637_v63  ;;  %v1638_v32 = vmul.f32 -1.442695, %v387_v31 }
 0x1e4   :  { %v338_v29 = vpop.f32.mrf.mxu0  ;;  %v1781_v30 = vpop.f32.mrf.mxu1 }
 0x1e5   :  { %1952 = vpow2.f32 %v1638_v32 }
 0x1f0   :  { %v1951_v33 = vpop.eup %1950 }
 0x1f1   :  { %v384_v34 = vadd.f32 1.0, %v1951_v33  ;;  %v1641_v33 = vld [vmem:[%s2776_s0 + $0x40] sm:$0xff] }
 0x1f2   :  { %v1953_v35 = vpop.eup %1952 }
 0x1f3   :  { %1954 = vrcp.f32 %v384_v34  ;;  %v391_v36 = vadd.f32 1.0, %v1953_v35 }
 0x1f5   :  { %1956 = vrcp.f32 %v391_v36 }
 0x200   :  { %v1955_v38 = vpop.eup %1954 }
 0x201   :  { %v395_v40 = vmul.f32 %v1955_v38, %v394_v37 }
 0x202   :  { %v1957_v42 = vpop.eup %1956 }
 0x203   :  { %v396_v41 = vadd.f32 %v1636_v39, %v395_v40  ;;  %v398_v44 = vsub.f32 1.0, %v1957_v42  ;;  %v400_v47 = vmul.f32 %v1957_v42, %v2287_v55 }
 0x205   :  { %1958 = vtanh.f32 %v396_v41 }
 0x212   :  { %v1959_v45 = vpop.eup %1958 }
 0x213   :  { %v399_v46 = vmul.f32 %v1959_v45, %v398_v44  ;;  %v1644_v44 = vld [vmem:[%s2776_s0 + $0x48] sm:$0xff] }
 0x215   :  { %v2337_v48 = vadd.f32 %v400_v47, %v399_v46 }
 0x217   :  { %v406_v49 = vpack.c.bf16 %v2337_v48, %v2337_v48 }
 0x219   :  { %440 = vmatmul.mubr.bf16.vlgmr.msra.gmra.mxu0 %v406_v49  ;;  %1799 = vmatmul.mubr.bf16.vlgmr.msra.gmra.mxu1 %v406_v49 }
 0x21a   :  { %516 = vmatpush1.bf16.msra.mxu0 %v2086_v3  ;;  %1803 = vmatpush3.bf16.msra.mxu1 %v2125_v9 }
 0x21b   :  { %517 = vmatprep.subr.bf16.mxu0 %v2095_v4  ;;  %1804 = vmatprep.subr.bf16.mxu1 %v2042_v1 }
 0x21c   :  { %547 = vmatprep.mubr.bf16.mxu0 %v2043_v2  ;;  %1818 = vmatprep.mubr.msk.bf16.mxu1 %vm2044_vm0, %v2042_v1 }
 0x21e   :  { %518 = vmatpush1.bf16.msra.mxu0 %v2102_v5  ;;  %1805 = vmatpush3.bf16.msra.mxu1 %v2143_v12 }
 0x21f   :  { %519 = vmatprep.subr.bf16.mxu0 %v2108_v6  ;;  %1806 = vmatprep.subr.bf16.mxu1 %v2042_v1 }
 0x222   :  { %520 = vmatpush1.bf16.msra.mxu0 %v2114_v7  ;;  %1807 = vmatpush3.bf16.msra.mxu1 %v2162_v15 }
 0x223   :  { %521 = vmatprep.subr.bf16.mxu0 %v2120_v8  ;;  %1808 = vmatprep.subr.bf16.mxu1 %v2042_v1 }
 0x226   :  { %522 = vmatpush1.bf16.msra.mxu0 %v2131_v10  ;;  %1809 = vmatpush3.bf16.msra.mxu1 %v2181_v18 }
 0x227   :  { %523 = vmatprep.subr.bf16.mxu0 %v2136_v11  ;;  %1810 = vmatprep.subr.bf16.mxu1 %v2042_v1 }
 0x22a   :  { %524 = vmatpush1.bf16.msra.mxu0 %v2149_v13  ;;  %1811 = vmatpush3.bf16.msra.mxu1 %v2200_v21 }
 0x22b   :  { %525 = vmatprep.subr.bf16.mxu0 %v2155_v14  ;;  %1812 = vmatprep.subr.bf16.mxu1 %v2042_v1 }
 0x22e   :  { %526 = vmatpush1.bf16.msra.mxu0 %v2169_v16  ;;  %1813 = vmatpush3.bf16.msra.mxu1 %v2214_v23 }
 0x22f   :  { %527 = vmatprep.subr.bf16.mxu0 %v2175_v17  ;;  %1814 = vmatprep.subr.bf16.mxu1 %v2042_v1 }
 0x232   :  { %528 = vmatpush1.bf16.msra.mxu0 %v2188_v19  ;;  %1815 = vmatpush3.bf16.msra.mxu1 %v2222_v24 }
 0x233   :  { %529 = vmatprep.subr.bf16.mxu0 %v2194_v20  ;;  %1816 = vmatprep.subr.bf16.mxu1 %v2042_v1 }
 0x236   :  { %530 = vmatpush1.bf16.msra.mxu0 %v2207_v22  ;;  %1817 = vmatpush3.bf16.msra.mxu1 %v2233_v25 }
 0x237   :  { %623 = vmatprep.subr.bf16.mxu0 %v2079_v0  ;;  %1822 = vmatprep.subr.bf16.mxu1 %v2042_v1 }
 0x2d9   :  { %v441_v51 = vpop.f32.mrf.mxu0  ;;  %v482_v52 = vpop.f32.mrf.mxu1 }
 0x2da   :  { %v488_v53 = vadd.f32 %v1639_v50, %v441_v51  ;;  %v502_v31 = vadd.f32 %v2281_v43, %v482_v52  ;;  %v1645_v52 = vld [vmem:[%s2776_s0 + $0x50] sm:$0xff] }
 0x2db   :  { %v443_v54 = vpop.f32.mrf.mxu0  ;;  %v1800_v56 = vpop.f32.mrf.mxu1 }
 0x2dc   :  { %v1642_v57 = vmul.f32 -1.442695, %v488_v53  ;;  %v495_v63 = vadd.f32 %v1640_v58, %v443_v54 }
 0x2dd   :  { %v445_v59 = vpop.f32.mrf.mxu0  ;;  %v485_v60 = vpop.f32.mrf.mxu1 }
 0x2de   :  { %1960 = vpow2.f32 %v1642_v57  ;;  %v1643_v26 = vmul.f32 -1.442695, %v495_v63 }
 0x2df   :  { %v446_v61 = vpop.f32.mrf.mxu0  ;;  %v1801_v62 = vpop.f32.mrf.mxu1 }
 0x2e0   :  { %1962 = vpow2.f32 %v1643_v26 }
 0x2eb   :  { %v1961_v27 = vpop.eup %1960 }
 0x2ec   :  { %v492_v28 = vadd.f32 1.0, %v1961_v27 }
 0x2ed   :  { %v1963_v29 = vpop.eup %1962 }
 0x2ee   :  { %1964 = vrcp.f32 %v492_v28  ;;  %v499_v30 = vadd.f32 1.0, %v1963_v29  ;;  %v1646_v28 = vld [vmem:[%s2776_s0 + $0x58] sm:$0xff] }
 0x2f0   :  { %1966 = vrcp.f32 %v499_v30 }
 0x2fb   :  { %v1965_v32 = vpop.eup %1964 }
 0x2fc   :  { %v503_v34 = vmul.f32 %v1965_v32, %v502_v31 }
 0x2fd   :  { %v1967_v36 = vpop.eup %1966 }
 0x2fe   :  { %v504_v35 = vadd.f32 %v1641_v33, %v503_v34  ;;  %v506_v37 = vsub.f32 1.0, %v1967_v36  ;;  %v508_v40 = vmul.f32 %v1967_v36, %v2337_v48 }
 0x300   :  { %1968 = vtanh.f32 %v504_v35 }
 0x30d   :  { %v1969_v38 = vpop.eup %1968 }
 0x30e   :  { %v507_v39 = vmul.f32 %v1969_v38, %v506_v37  ;;  %v1649_v38 = vld [vmem:[%s2776_s0 + $0x60] sm:$0xff] }
 0x310   :  { %v2387_v41 = vadd.f32 %v508_v40, %v507_v39 }
 0x312   :  { %v514_v42 = vpack.c.bf16 %v2387_v41, %v2387_v41 }
 0x314   :  { %548 = vmatmul.mubr.bf16.vlgmr.msra.gmra.mxu0 %v514_v42  ;;  %1819 = vmatmul.mubr.bf16.vlgmr.msra.gmra.mxu1 %v514_v42 }
 0x315   :  { %624 = vmatpush1.bf16.msra.mxu0 %v2086_v3  ;;  %1823 = vmatpush3.bf16.msra.mxu1 %v2125_v9 }
 0x316   :  { %625 = vmatprep.subr.bf16.mxu0 %v2095_v4  ;;  %1824 = vmatprep.subr.bf16.mxu1 %v2042_v1 }
 0x317   :  { %655 = vmatprep.mubr.bf16.mxu0 %v2043_v2  ;;  %1838 = vmatprep.mubr.msk.bf16.mxu1 %vm2044_vm0, %v2042_v1 }
 0x319   :  { %626 = vmatpush1.bf16.msra.mxu0 %v2102_v5  ;;  %1825 = vmatpush3.bf16.msra.mxu1 %v2143_v12 }
 0x31a   :  { %627 = vmatprep.subr.bf16.mxu0 %v2108_v6  ;;  %1826 = vmatprep.subr.bf16.mxu1 %v2042_v1 }
 0x31d   :  { %628 = vmatpush1.bf16.msra.mxu0 %v2114_v7  ;;  %1827 = vmatpush3.bf16.msra.mxu1 %v2162_v15 }
 0x31e   :  { %629 = vmatprep.subr.bf16.mxu0 %v2120_v8  ;;  %1828 = vmatprep.subr.bf16.mxu1 %v2042_v1 }
 0x321   :  { %630 = vmatpush1.bf16.msra.mxu0 %v2131_v10  ;;  %1829 = vmatpush3.bf16.msra.mxu1 %v2181_v18 }
 0x322   :  { %631 = vmatprep.subr.bf16.mxu0 %v2136_v11  ;;  %1830 = vmatprep.subr.bf16.mxu1 %v2042_v1 }
 0x325   :  { %632 = vmatpush1.bf16.msra.mxu0 %v2149_v13  ;;  %1831 = vmatpush3.bf16.msra.mxu1 %v2200_v21 }
 0x326   :  { %633 = vmatprep.subr.bf16.mxu0 %v2155_v14  ;;  %1832 = vmatprep.subr.bf16.mxu1 %v2042_v1 }
 0x329   :  { %634 = vmatpush1.bf16.msra.mxu0 %v2169_v16  ;;  %1833 = vmatpush3.bf16.msra.mxu1 %v2214_v23 }
 0x32a   :  { %635 = vmatprep.subr.bf16.mxu0 %v2175_v17  ;;  %1834 = vmatprep.subr.bf16.mxu1 %v2042_v1 }
 0x32d   :  { %636 = vmatpush1.bf16.msra.mxu0 %v2188_v19  ;;  %1835 = vmatpush3.bf16.msra.mxu1 %v2222_v24 }
 0x32e   :  { %637 = vmatprep.subr.bf16.mxu0 %v2194_v20  ;;  %1836 = vmatprep.subr.bf16.mxu1 %v2042_v1 }
 0x331   :  { %638 = vmatpush1.bf16.msra.mxu0 %v2207_v22  ;;  %1837 = vmatpush3.bf16.msra.mxu1 %v2233_v25 }
 0x332   :  { %731 = vmatprep.subr.bf16.mxu0 %v2079_v0  ;;  %1842 = vmatprep.subr.bf16.mxu1 %v2042_v1 }
 0x3d4   :  { %v549_v45 = vpop.f32.mrf.mxu0  ;;  %v590_v46 = vpop.f32.mrf.mxu1 }
 0x3d5   :  { %v596_v47 = vadd.f32 %v1644_v44, %v549_v45  ;;  %v610_v26 = vadd.f32 %v2281_v43, %v590_v46 }
 0x3d6   :  { %v551_v49 = vpop.f32.mrf.mxu0  ;;  %v1820_v50 = vpop.f32.mrf.mxu1 }
 0x3d7   :  { %v1647_v51 = vmul.f32 -1.442695, %v596_v47  ;;  %v603_v58 = vadd.f32 %v1645_v52, %v551_v49  ;;  %v1650_v47 = vld [vmem:[%s2776_s0 + $0x68] sm:$0xff] }
 0x3d8   :  { %v553_v53 = vpop.f32.mrf.mxu0  ;;  %v593_v54 = vpop.f32.mrf.mxu1 }
 0x3d9   :  { %1970 = vpow2.f32 %v1647_v51  ;;  %v1648_v59 = vmul.f32 -1.442695, %v603_v58 }
 0x3da   :  { %v554_v56 = vpop.f32.mrf.mxu0  ;;  %v1821_v57 = vpop.f32.mrf.mxu1 }
 0x3db   :  { %1972 = vpow2.f32 %v1648_v59 }
 0x3e6   :  { %v1971_v60 = vpop.eup %1970 }
 0x3e7   :  { %v600_v61 = vadd.f32 1.0, %v1971_v60 }
 0x3e8   :  { %v1973_v62 = vpop.eup %1972 }
 0x3e9   :  { %1974 = vrcp.f32 %v600_v61  ;;  %v607_v63 = vadd.f32 1.0, %v1973_v62  ;;  %v1651_v62 = vld [vmem:[%s2776_s0 + $0x70] sm:$0xff] }
 0x3eb   :  { %1976 = vrcp.f32 %v607_v63 }
 0x3f6   :  { %v1975_v27 = vpop.eup %1974 }
 0x3f7   :  { %v611_v29 = vmul.f32 %v1975_v27, %v610_v26 }
 0x3f8   :  { %v1977_v31 = vpop.eup %1976 }
 0x3f9   :  { %v612_v30 = vadd.f32 %v1646_v28, %v611_v29  ;;  %v614_v32 = vsub.f32 1.0, %v1977_v31  ;;  %v616_v35 = vmul.f32 %v1977_v31, %v2387_v41 }
 0x3fb   :  { %1978 = vtanh.f32 %v612_v30 }
 0x408   :  { %v1979_v33 = vpop.eup %1978 }
 0x409   :  { %v615_v34 = vmul.f32 %v1979_v33, %v614_v32 }
 0x40b   :  { %v2437_v36 = vadd.f32 %v616_v35, %v615_v34 }
 0x40d   :  { %v622_v37 = vpack.c.bf16 %v2437_v36, %v2437_v36 }
 0x40f   :  { %656 = vmatmul.mubr.bf16.vlgmr.msra.gmra.mxu0 %v622_v37  ;;  %1839 = vmatmul.mubr.bf16.vlgmr.msra.gmra.mxu1 %v622_v37 }
 0x410   :  { %732 = vmatpush1.bf16.msra.mxu0 %v2086_v3  ;;  %1843 = vmatpush3.bf16.msra.mxu1 %v2125_v9 }
 0x411   :  { %733 = vmatprep.subr.bf16.mxu0 %v2095_v4  ;;  %1844 = vmatprep.subr.bf16.mxu1 %v2042_v1 }
 0x412   :  { %763 = vmatprep.mubr.bf16.mxu0 %v2043_v2  ;;  %1858 = vmatprep.mubr.msk.bf16.mxu1 %vm2044_vm0, %v2042_v1 }
 0x414   :  { %734 = vmatpush1.bf16.msra.mxu0 %v2102_v5  ;;  %1845 = vmatpush3.bf16.msra.mxu1 %v2143_v12 }
 0x415   :  { %735 = vmatprep.subr.bf16.mxu0 %v2108_v6  ;;  %1846 = vmatprep.subr.bf16.mxu1 %v2042_v1 }
 0x418   :  { %736 = vmatpush1.bf16.msra.mxu0 %v2114_v7  ;;  %1847 = vmatpush3.bf16.msra.mxu1 %v2162_v15 }
 0x419   :  { %737 = vmatprep.subr.bf16.mxu0 %v2120_v8  ;;  %1848 = vmatprep.subr.bf16.mxu1 %v2042_v1 }
 0x41c   :  { %738 = vmatpush1.bf16.msra.mxu0 %v2131_v10  ;;  %1849 = vmatpush3.bf16.msra.mxu1 %v2181_v18 }
 0x41d   :  { %739 = vmatprep.subr.bf16.mxu0 %v2136_v11  ;;  %1850 = vmatprep.subr.bf16.mxu1 %v2042_v1 }
 0x420   :  { %740 = vmatpush1.bf16.msra.mxu0 %v2149_v13  ;;  %1851 = vmatpush3.bf16.msra.mxu1 %v2200_v21 }
 0x421   :  { %741 = vmatprep.subr.bf16.mxu0 %v2155_v14  ;;  %1852 = vmatprep.subr.bf16.mxu1 %v2042_v1 }
 0x424   :  { %742 = vmatpush1.bf16.msra.mxu0 %v2169_v16  ;;  %1853 = vmatpush3.bf16.msra.mxu1 %v2214_v23 }
 0x425   :  { %743 = vmatprep.subr.bf16.mxu0 %v2175_v17  ;;  %1854 = vmatprep.subr.bf16.mxu1 %v2042_v1 }
 0x428   :  { %744 = vmatpush1.bf16.msra.mxu0 %v2188_v19  ;;  %1855 = vmatpush3.bf16.msra.mxu1 %v2222_v24 }
 0x429   :  { %745 = vmatprep.subr.bf16.mxu0 %v2194_v20  ;;  %1856 = vmatprep.subr.bf16.mxu1 %v2042_v1 }
 0x42c   :  { %746 = vmatpush1.bf16.msra.mxu0 %v2207_v22  ;;  %1857 = vmatpush3.bf16.msra.mxu1 %v2233_v25 }
 0x42d   :  { %839 = vmatprep.subr.bf16.mxu0 %v2079_v0  ;;  %1862 = vmatprep.subr.bf16.mxu1 %v2042_v1 }
 0x4cf   :  { %v657_v39 = vpop.f32.mrf.mxu0  ;;  %v698_v40 = vpop.f32.mrf.mxu1 }
 0x4d0   :  { %v704_v42 = vadd.f32 %v1649_v38, %v657_v39  ;;  %v718_v60 = vadd.f32 %v2281_v43, %v698_v40  ;;  %v1655_v38 = vld [vmem:[%s2776_s0 + $0x80] sm:$0xff] }
 0x4d1   :  { %v659_v44 = vpop.f32.mrf.mxu0  ;;  %v1840_v45 = vpop.f32.mrf.mxu1 }
 0x4d2   :  { %v1652_v46 = vmul.f32 -1.442695, %v704_v42  ;;  %v711_v53 = vadd.f32 %v1650_v47, %v659_v44 }
 0x4d3   :  { %v661_v49 = vpop.f32.mrf.mxu0  ;;  %v701_v50 = vpop.f32.mrf.mxu1 }
 0x4d4   :  { %1980 = vpow2.f32 %v1652_v46  ;;  %v1653_v54 = vmul.f32 -1.442695, %v711_v53  ;;  %v1656_v53 = vld [vmem:[%s2776_s0 + $0x88] sm:$0xff] }
 0x4d5   :  { %v662_v51 = vpop.f32.mrf.mxu0  ;;  %v1841_v52 = vpop.f32.mrf.mxu1 }
 0x4d6   :  { %1982 = vpow2.f32 %v1653_v54 }
 0x4e1   :  { %v1981_v56 = vpop.eup %1980 }
 0x4e2   :  { %v708_v57 = vadd.f32 1.0, %v1981_v56 }
 0x4e3   :  { %v1983_v58 = vpop.eup %1982 }
 0x4e4   :  { %1984 = vrcp.f32 %v708_v57  ;;  %v715_v59 = vadd.f32 1.0, %v1983_v58 }
 0x4e6   :  { %1986 = vrcp.f32 %v715_v59 }
 0x4f1   :  { %v1985_v61 = vpop.eup %1984 }
 0x4f2   :  { %v719_v63 = vmul.f32 %v1985_v61, %v718_v60 }
 0x4f3   :  { %v1987_v27 = vpop.eup %1986 }
 0x4f4   :  { %v720_v26 = vadd.f32 %v1651_v62, %v719_v63  ;;  %v722_v28 = vsub.f32 1.0, %v1987_v27  ;;  %v724_v31 = vmul.f32 %v1987_v27, %v2437_v36  ;;  %v2039_v27 = vld [vmem:[%s2775_s1 + $0x94] ss:$12 sps:$4 sm:$0xff]  }
 0x4f6   :  { %1988 = vtanh.f32 %v720_v26  ;;  %v2038_v26 = vld [vmem:[%s2775_s1 + $0xa8] ss:$12 sps:$4 sm:$0xff]  }
 0x503   :  { %v1989_v29 = vpop.eup %1988 }
 0x504   :  { %v723_v30 = vmul.f32 %v1989_v29, %v722_v28  ;;  %v2040_v28 = vld [vmem:[%s2775_s1 + $0x90] ss:$12 sps:$4 sm:$0xff]   ;;  %v1661_v29 = vld [vmem:[%s2776_s0 + $0xa0] sm:$0xff] }
 0x506   :  { %v2487_v32 = vadd.f32 %v724_v31, %v723_v30 }
 0x508   :  { %v730_v33 = vpack.c.bf16 %v2487_v32, %v2487_v32 }
 0x50a   :  { %764 = vmatmul.mubr.bf16.vlgmr.msra.gmra.mxu0 %v730_v33  ;;  %1859 = vmatmul.mubr.bf16.vlgmr.msra.gmra.mxu1 %v730_v33 }
 0x50b   :  { %840 = vmatpush1.bf16.msra.mxu0 %v2086_v3  ;;  %1863 = vmatpush3.bf16.msra.mxu1 %v2125_v9  ;;  %v1654_v3 = vld [vmem:[%s2776_s0 + $0x78] sm:$0xff] }
 0x50c   :  { %841 = vmatprep.subr.bf16.mxu0 %v2095_v4  ;;  %1864 = vmatprep.subr.bf16.mxu1 %v2042_v1 }
 0x50d   :  { %871 = vmatprep.mubr.bf16.mxu0 %v2043_v2  ;;  %1878 = vmatprep.mubr.msk.bf16.mxu1 %vm2044_vm0, %v2042_v1 }
 0x50f   :  { %842 = vmatpush1.bf16.msra.mxu0 %v2102_v5  ;;  %1865 = vmatpush3.bf16.msra.mxu1 %v2143_v12 }
 0x510   :  { %843 = vmatprep.subr.bf16.mxu0 %v2108_v6  ;;  %1866 = vmatprep.subr.bf16.mxu1 %v2042_v1 }
 0x513   :  { %844 = vmatpush1.bf16.msra.mxu0 %v2114_v7  ;;  %1867 = vmatpush3.bf16.msra.mxu1 %v2162_v15 }
 0x514   :  { %845 = vmatprep.subr.bf16.mxu0 %v2120_v8  ;;  %1868 = vmatprep.subr.bf16.mxu1 %v2042_v1 }
 0x517   :  { %846 = vmatpush1.bf16.msra.mxu0 %v2131_v10  ;;  %1869 = vmatpush3.bf16.msra.mxu1 %v2181_v18 }
 0x518   :  { %847 = vmatprep.subr.bf16.mxu0 %v2136_v11  ;;  %1870 = vmatprep.subr.bf16.mxu1 %v2042_v1 }
 0x51b   :  { %848 = vmatpush1.bf16.msra.mxu0 %v2149_v13  ;;  %1871 = vmatpush3.bf16.msra.mxu1 %v2200_v21 }
 0x51c   :  { %849 = vmatprep.subr.bf16.mxu0 %v2155_v14  ;;  %1872 = vmatprep.subr.bf16.mxu1 %v2042_v1 }
 0x51f   :  { %850 = vmatpush1.bf16.msra.mxu0 %v2169_v16  ;;  %1873 = vmatpush3.bf16.msra.mxu1 %v2214_v23 }
 0x520   :  { %851 = vmatprep.subr.bf16.mxu0 %v2175_v17  ;;  %1874 = vmatprep.subr.bf16.mxu1 %v2042_v1 }
 0x523   :  { %852 = vmatpush1.bf16.msra.mxu0 %v2188_v19  ;;  %1875 = vmatpush3.bf16.msra.mxu1 %v2222_v24 }
 0x524   :  { %853 = vmatprep.subr.bf16.mxu0 %v2194_v20  ;;  %1876 = vmatprep.subr.bf16.mxu1 %v2042_v1 }
 0x527   :  { %854 = vmatpush1.bf16.msra.mxu0 %v2207_v22  ;;  %1877 = vmatpush3.bf16.msra.mxu1 %v2233_v25 }
 0x528   :  { %947 = vmatprep.subr.bf16.mxu0 %v2079_v0  ;;  %1882 = vmatprep.subr.bf16.mxu1 %v2042_v1 }
 0x5ca   :  { %v765_v4 = vpop.f32.mrf.mxu0  ;;  %v806_v5 = vpop.f32.mrf.mxu1 }
 0x5cb   :  { %v812_v6 = vadd.f32 %v1654_v3, %v765_v4  ;;  %v826_v51 = vadd.f32 %v2281_v43, %v806_v5 }
 0x5cc   :  { %v767_v34 = vpop.f32.mrf.mxu0  ;;  %v1860_v35 = vpop.f32.mrf.mxu1 }
 0x5cd   :  { %v1657_v37 = vmul.f32 -1.442695, %v812_v6  ;;  %v819_v44 = vadd.f32 %v1655_v38, %v767_v34 }
 0x5ce   :  { %v769_v39 = vpop.f32.mrf.mxu0  ;;  %v809_v40 = vpop.f32.mrf.mxu1 }
 0x5cf   :  { %1990 = vpow2.f32 %v1657_v37  ;;  %v1658_v45 = vmul.f32 -1.442695, %v819_v44  ;;  %v1664_v37 = vld [vmem:[%s2776_s0 + $0xa8] sm:$0xff] }
 0x5d0   :  { %v770_v0 = vpop.f32.mrf.mxu0  ;;  %v1861_v42 = vpop.f32.mrf.mxu1 }
 0x5d1   :  { %1992 = vpow2.f32 %v1658_v45  ;;  %v1665_v45 = vld [vmem:[%s2776_s0 + $0xb0] sm:$0xff] }
 0x5dc   :  { %v1991_v46 = vpop.eup %1990 }
 0x5dd   :  { %v816_v47 = vadd.f32 1.0, %v1991_v46 }
 0x5de   :  { %v1993_v49 = vpop.eup %1992 }
 0x5df   :  { %1994 = vrcp.f32 %v816_v47  ;;  %v823_v50 = vadd.f32 1.0, %v1993_v49 }
 0x5e1   :  { %1996 = vrcp.f32 %v823_v50 }
 0x5ec   :  { %v1995_v52 = vpop.eup %1994 }
 0x5ed   :  { %v827_v54 = vmul.f32 %v1995_v52, %v826_v51 }
 0x5ee   :  { %v1997_v57 = vpop.eup %1996 }
 0x5ef   :  { %v828_v56 = vadd.f32 %v1656_v53, %v827_v54  ;;  %v830_v58 = vsub.f32 1.0, %v1997_v57  ;;  %v832_v61 = vmul.f32 %v1997_v57, %v2487_v32 }
 0x5f1   :  { %1998 = vtanh.f32 %v828_v56 }
 0x5fe   :  { %v1999_v59 = vpop.eup %1998 }
 0x5ff   :  { %v831_v60 = vmul.f32 %v1999_v59, %v830_v58 }
 0x601   :  { %v2537_v62 = vadd.f32 %v832_v61, %v831_v60  ;;  %v1666_v60 = vld [vmem:[%s2776_s0 + $0xb8] sm:$0xff] }
 0x603   :  { %v838_v63 = vpack.c.bf16 %v2537_v62, %v2537_v62 }
 0x605   :  { %872 = vmatmul.mubr.bf16.vlgmr.msra.gmra.mxu0 %v838_v63  ;;  %1879 = vmatmul.mubr.bf16.vlgmr.msra.gmra.mxu1 %v838_v63 }
 0x606   :  { %948 = vmatpush1.bf16.msra.mxu0 %v2038_v26  ;;  %1883 = vmatpush3.bf16.msra.mxu1 %v2125_v9  ;;  %v2041_v9 = vld [vmem:[%s2775_s1 + $0x7c] ss:$12 sps:$4 sm:$0xff]   ;;  %v1050_v26 = vlaneseq }
 0x607   :  { %949 = vmatprep.subr.bf16.mxu0 %v2039_v27  ;;  %1884 = vmatprep.subr.bf16.mxu1 %v2042_v1 }
 0x608   :  { %979 = vmatprep.mubr.bf16.mxu0 %v2043_v2  ;;  %1898 = vmatprep.mubr.msk.bf16.mxu1 %vm2044_vm0, %v2042_v1  ;;  %v1659_v2 = vld [vmem:[%s2776_s0 + $0x90] sm:$0xff] }
 0x60a   :  { %950 = vmatpush1.bf16.msra.mxu0 %v2040_v28  ;;  %1885 = vmatpush3.bf16.msra.mxu1 %v2143_v12 }
 0x60b   :  { %951 = vmatprep.subr.bf16.mxu0 %v2041_v9  ;;  %1886 = vmatprep.subr.bf16.mxu1 %v2042_v1  ;;  %v2604_v9 = vand.u32 127, %v1050_v26 }
 0x60d   :  { %vm1052_vm1 = vcmp.lt.s32.totalorder %v2604_v9, 32 }
 0x60e   :  { %952 = vmatpush1.bf16.msra.mxu0 %v2114_v7  ;;  %1887 = vmatpush3.bf16.msra.mxu1 %v2162_v15 }
 0x60f   :  { %953 = vmatprep.subr.bf16.mxu0 %v2120_v8  ;;  %1888 = vmatprep.subr.bf16.mxu1 %v2042_v1 }
 0x612   :  { %954 = vmatpush1.bf16.msra.mxu0 %v2131_v10  ;;  %1889 = vmatpush3.bf16.msra.mxu1 %v2181_v18 }
 0x613   :  { %955 = vmatprep.subr.bf16.mxu0 %v2136_v11  ;;  %1890 = vmatprep.subr.bf16.mxu1 %v2042_v1 }
 0x616   :  { %956 = vmatpush1.bf16.msra.mxu0 %v2149_v13  ;;  %1891 = vmatpush3.bf16.msra.mxu1 %v2200_v21 }
 0x617   :  { %957 = vmatprep.subr.bf16.mxu0 %v2155_v14  ;;  %1892 = vmatprep.subr.bf16.mxu1 %v2042_v1  ;;  %v1660_v14 = vld [vmem:[%s2776_s0 + $0x98] sm:$0xff] }
 0x61a   :  { %958 = vmatpush1.bf16.msra.mxu0 %v2169_v16  ;;  %1893 = vmatpush3.bf16.msra.mxu1 %v2214_v23 }
 0x61b   :  { %959 = vmatprep.subr.bf16.mxu0 %v2175_v17  ;;  %1894 = vmatprep.subr.bf16.mxu1 %v2042_v1 }
 0x61e   :  { %960 = vmatpush1.bf16.msra.mxu0 %v2188_v19  ;;  %1895 = vmatpush3.bf16.msra.mxu1 %v2222_v24 }
 0x61f   :  { %961 = vmatprep.subr.bf16.mxu0 %v2194_v20  ;;  %1896 = vmatprep.subr.bf16.mxu1 %v2042_v1 }
 0x622   :  { %962 = vmatpush1.bf16.msra.mxu0 %v2207_v22  ;;  %1897 = vmatpush3.bf16.msra.mxu1 %v2233_v25 }
 0x6c5   :  { %v873_v7 = vpop.f32.mrf.mxu0  ;;  %v914_v8 = vpop.f32.mrf.mxu1 }
 0x6c6   :  { %v920_v10 = vadd.f32 %v1659_v2, %v873_v7  ;;  %v934_v24 = vadd.f32 %v2281_v43, %v914_v8 }
 0x6c7   :  { %v875_v11 = vpop.f32.mrf.mxu0  ;;  %v1880_v12 = vpop.f32.mrf.mxu1 }
 0x6c8   :  { %v1662_v13 = vmul.f32 -1.442695, %v920_v10  ;;  %v927_v18 = vadd.f32 %v1660_v14, %v875_v11  ;;  %v2624_v14 = vsel %vm1052_vm1, %v2437_v36, %v2487_v32 }
 0x6c9   :  { %v877_v15 = vpop.f32.mrf.mxu0  ;;  %v917_v1 = vpop.f32.mrf.mxu1 }
 0x6ca   :  { %2000 = vpow2.f32 %v1662_v13  ;;  %v1663_v19 = vmul.f32 -1.442695, %v927_v18 }
 0x6cb   :  { %v878_v16 = vpop.f32.mrf.mxu0  ;;  %v1881_v17 = vpop.f32.mrf.mxu1 }
 0x6cc   :  { %2002 = vpow2.f32 %v1663_v19  ;;  %v2637_v17 = vsel %vm1052_vm1, %v2537_v62, %v2387_v41  ;;  %v2644_v19 = vsel %vm1052_vm1, %v2487_v32, %v2437_v36 }
 0x6d7   :  { %v2001_v20 = vpop.eup %2000 }
 0x6d8   :  { %v924_v21 = vadd.f32 1.0, %v2001_v20 }
 0x6d9   :  { %v2003_v22 = vpop.eup %2002 }
 0x6da   :  { %2004 = vrcp.f32 %v924_v21  ;;  %v931_v23 = vadd.f32 1.0, %v2003_v22 }
 0x6dc   :  { %2006 = vrcp.f32 %v931_v23 }
 0x6e7   :  { %v2005_v25 = vpop.eup %2004 }
 0x6e8   :  { %v935_v30 = vmul.f32 %v2005_v25, %v934_v24 }
 0x6e9   :  { %v2007_v33 = vpop.eup %2006 }
 0x6ea   :  { %v936_v31 = vadd.f32 %v1661_v29, %v935_v30  ;;  %v938_v3 = vsub.f32 1.0, %v2007_v33  ;;  %v940_v6 = vmul.f32 %v2007_v33, %v2537_v62 }
 0x6ec   :  { %2008 = vtanh.f32 %v936_v31 }
 0x6f9   :  { %v2009_v4 = vpop.eup %2008 }
 0x6fa   :  { %v939_v5 = vmul.f32 %v2009_v4, %v938_v3 }
 0x6fc   :  { %v941_v34 = vadd.f32 %v940_v6, %v939_v5 }
 0x6fe   :  { %v946_v35 = vpack.c.bf16 %v941_v34, %v941_v34  ;;  %v2630_v1 = vsel %vm1052_vm1, %v2337_v48, %v941_v34 }
 0x700   :  { %980 = vmatmul.mubr.bf16.vlgmr.msra.gmra.mxu0 %v946_v35  ;;  %1899 = vmatmul.mubr.bf16.vlgmr.msra.gmra.mxu1 %v946_v35 }
 0x7c0   :  { %v981_v38 = vpop.f32.mrf.mxu0  ;;  %v1022_v39 = vpop.f32.mrf.mxu1 }
 0x7c1   :  { %v1028_v40 = vadd.f32 %v1664_v37, %v981_v38  ;;  %v1042_v58 = vadd.f32 %v2281_v43, %v1022_v39  ;;  %v2611_v43 = vsel %vm1052_vm1, %v2387_v41, %v2537_v62  ;;  %v2656_v62 = vsel %vm1052_vm1, %v941_v34, %v2337_v48 }
 0x7c2   :  { %v983_v0 = vpop.f32.mrf.mxu0  ;;  %v1900_v42 = vpop.f32.mrf.mxu1 }
 0x7c3   :  { %v1667_v44 = vmul.f32 -1.442695, %v1028_v40  ;;  %v1035_v51 = vadd.f32 %v1665_v45, %v983_v0 }
 0x7c4   :  { %v985_v46 = vpop.f32.mrf.mxu0  ;;  %v1025_v47 = vpop.f32.mrf.mxu1 }
 0x7c5   :  { %2010 = vpow2.f32 %v1667_v44  ;;  %v1668_v52 = vmul.f32 -1.442695, %v1035_v51 }
 0x7c6   :  { %v986_v49 = vpop.f32.mrf.mxu0  ;;  %v1901_v50 = vpop.f32.mrf.mxu1 }
 0x7c7   :  { %2012 = vpow2.f32 %v1668_v52 }
 0x7d2   :  { %v2011_v53 = vpop.eup %2010 }
 0x7d3   :  { %v1032_v54 = vadd.f32 1.0, %v2011_v53 }
 0x7d4   :  { %v2013_v56 = vpop.eup %2012 }
 0x7d5   :  { %2014 = vrcp.f32 %v1032_v54  ;;  %v1039_v57 = vadd.f32 1.0, %v2013_v56 }
 0x7d7   :  { %2016 = vrcp.f32 %v1039_v57 }
 0x7e2   :  { %v2015_v59 = vpop.eup %2014 }
 0x7e3   :  { %v1043_v61 = vmul.f32 %v2015_v59, %v1042_v58 }
 0x7e4   :  { %v2017_v27 = vpop.eup %2016 }
 0x7e5   :  { %v1044_v63 = vadd.f32 %v1666_v60, %v1043_v61  ;;  %v1046_v28 = vsub.f32 1.0, %v2017_v27  ;;  %v1048_v8 = vmul.f32 %v2017_v27, %v941_v34 }
 0x7e7   :  { %2018 = vtanh.f32 %v1044_v63 }
 0x7f4   :  { %v2019_v2 = vpop.eup %2018 }
 0x7f5   :  { %v1047_v7 = vmul.f32 %v2019_v2, %v1046_v28 }
 0x7f7   :  { %v1049_v10 = vadd.f32 %v1048_v8, %v1047_v7 }
 0x7f9   :  { %v1067_v11 = vmul.f32 %v2611_v43, %v1049_v10  ;;  %v2617_v12 = vsel %vm1052_vm1, %v2287_v55, %v1049_v10  ;;  %v1070_v15 = vmul.f32 %v2624_v14, %v1049_v10  ;;  %v1064_v16 = vmul.f32 %v2630_v1, %v1049_v10 }
 0x7fa   :  { %v1061_v13 = vmul.f32 %v2617_v12, %v1049_v10  ;;  %v1076_v18 = vmul.f32 %v2637_v17, %v1049_v10  ;;  %v1073_v20 = vmul.f32 %v2644_v19, %v1049_v10  ;;  %v2650_v21 = vsel %vm1052_vm1, %v1049_v10, %v2287_v55 }
 0x7fb   :  { %1068 = vadd.xlane.f32.xlu1 %v1067_v11  ;;  %v1082_v41 = vmul.f32 %v2650_v21, %v1049_v10  ;;  %v1079_v22 = vmul.f32 %v2656_v62, %v1049_v10  ;;  %v1130_v52 = vadd.f32 %v2630_v1, %v2617_v12  ;;  %v1131_v54 = vmax.f32 %v2617_v12, %v2630_v1 }
 0x7fc   :  { %1062 = vadd.xlane.f32.xlu0 %v1061_v13 }
 0x7fd   :  { %v1135_v56 = vadd.f32 %v1130_v52, %v2611_v43  ;;  %v1136_v59 = vmax.f32 %v1131_v54, %v2611_v43 }
 0x7ff   :  { %1071 = vadd.xlane.f32.xlu1 %v1070_v15  ;;  %v1140_v63 = vadd.f32 %v1135_v56, %v2624_v14  ;;  %v1141_v2 = vmax.f32 %v1136_v59, %v2624_v14 }
 0x800   :  { %1065 = vadd.xlane.f32.xlu0 %v1064_v16 }
 0x801   :  { %v1145_v10 = vadd.f32 %v1140_v63, %v2644_v19  ;;  %v1146_v15 = vmax.f32 %v1141_v2, %v2644_v19 }
 0x803   :  { %1077 = vadd.xlane.f32.xlu1 %v1076_v18 }
 0x804   :  { %1074 = vadd.xlane.f32.xlu0 %v1073_v20  ;;  %v1150_v20 = vadd.f32 %v1145_v10, %v2637_v17 }
 0x807   :  { %1083 = vadd.xlane.f32.xlu1 %v1082_v41 }
 0x808   :  { %1080 = vadd.xlane.f32.xlu0 %v1079_v22 }
 0x884   :  { %v1069_v36 = vpop.xlane.xlu1 %1068 }
 0x885   :  { %v1063_v32 = vpop.xlane.xlu0 %1062 }
 0x888   :  { %v1072_v23 = vpop.xlane.xlu1 %1071 }
 0x889   :  { %v1066_v24 = vpop.xlane.xlu0 %1065 }
 0x88a   :  { %v1085_v25 = vmax.f32 %v1063_v32, %v1066_v24 }
 0x88c   :  { %v1086_v55 = vmax.f32 %v1085_v25, %v1069_v36  ;;  %v1078_v31 = vpop.xlane.xlu1 %1077  ;;  %v1155_v25 = vadd.f32 %v1150_v20, %v2656_v62 }
 0x88d   :  { %v1075_v29 = vpop.xlane.xlu0 %1074 }
 0x88e   :  { %v1087_v30 = vmax.f32 %v1086_v55, %v1072_v23 }
 0x890   :  { %v1088_v33 = vmax.f32 %v1087_v30, %v1075_v29  ;;  %v1084_v6 = vpop.xlane.xlu1 %1083 }
 0x891   :  { %v1081_v4 = vpop.xlane.xlu0 %1080 }
 0x892   :  { %v1089_v3 = vmax.f32 %v1088_v33, %v1078_v31 }
 0x894   :  { %v1090_v5 = vmax.f32 %v1089_v3, %v1081_v4 }
 0x896   :  { %v1091_v48 = vmax.f32 %v1090_v5, %v1084_v6 }
 0x898   :  { %v1092_v34 = vsub.f32 %v1063_v32, %v1091_v48  ;;  %v1095_v35 = vsub.f32 %v1066_v24, %v1091_v48  ;;  %v1098_v37 = vsub.f32 %v1069_v36, %v1091_v48  ;;  %v1101_v38 = vsub.f32 %v1072_v23, %v1091_v48 }
 0x899   :  { %v1104_v42 = vsub.f32 %v1075_v29, %v1091_v48  ;;  %v1107_v45 = vsub.f32 %v1078_v31, %v1091_v48  ;;  %v1110_v47 = vsub.f32 %v1081_v4, %v1091_v48  ;;  %v1113_v50 = vsub.f32 %v1084_v6, %v1091_v48 }
 0x89a   :  { %v1093_v39 = vmul.f32 1.442695, %v1092_v34  ;;  %v1096_v40 = vmul.f32 1.442695, %v1095_v35  ;;  %v1099_v0 = vmul.f32 1.442695, %v1098_v37  ;;  %v1151_v23 = vmax.f32 %v1146_v15, %v2637_v17 }
 0x89b   :  { %v1102_v44 = vmul.f32 1.442695, %v1101_v38  ;;  %v1105_v46 = vmul.f32 1.442695, %v1104_v42  ;;  %v1108_v49 = vmul.f32 1.442695, %v1107_v45  ;;  %v1160_v31 = vadd.f32 %v1155_v25, %v2650_v21 }
 0x89c   :  { %2020 = vpow2.f32 %v1093_v39  ;;  %v1111_v51 = vmul.f32 1.442695, %v1110_v47  ;;  %v1114_v53 = vmul.f32 1.442695, %v1113_v50  ;;  %v2045_v36 = vmov 1966171168  }
 0x89d   :  { %2022 = vpow2.f32 %v1096_v40  ;;  %v1167_v32 = vunpack.c.l.s4 %v2045_v36  ;;  %v2673_v29 = vshrl.u32 %v1050_v26, 7  ;;  %v1156_v30 = vmax.f32 %v1151_v23, %v2656_v62 }
 0x89e   :  { %2024 = vpow2.f32 %v1099_v0  ;;  %v1162_v4 = vmul.f32 0.125, %v1160_v31 }
 0x89f   :  { %2026 = vpow2.f32 %v1102_v44  ;;  %v1168_v55 = vunpack.c.0.s8 %v1167_v32  ;;  %v1161_v3 = vmax.f32 %v1156_v30, %v2650_v21 }
 0x8a0   :  { %2028 = vpow2.f32 %v1105_v46  ;;  %v1165_v38 = vcombine.high %v1162_v4, %v1162_v4 }
 0x8a1   :  { %2030 = vpow2.f32 %v1108_v49  ;;  %v2678_v33 = vsub.s32 %v1168_v55, %v2673_v29  ;;  %v1263_v39 = vcombine.high %v1161_v3, %v1161_v3 }
 0x8a2   :  { %2032 = vpow2.f32 %v1111_v51  ;;  %v2691_v51 = vld [vmem:[%s2778_s3] sm:$0x3f] }
 0x8a3   :  { %2034 = vpow2.f32 %v1114_v53  ;;  %v1270_v5 = vrot.slane %v1161_v3, %v2678_v33  ;;  %v1172_v6 = vrot.slane %v1162_v4, %v2678_v33  ;;  %v1179_v53 = vrot.slane %v1165_v38, %v2678_v33 }
 0x8a4   :  { %v1277_v54 = vrot.slane %v1263_v39, %v2678_v33  ;;  %v2703_v59 = vrot.slane %v2691_v51, 2 }
 0x8a5   :  { %v1278_v26 = vcombine.high %v1270_v5, %v1270_v5  ;;  %v1180_v40 = vcombine.high %v1172_v6, %v1172_v6  ;;  %v1188_v45 = vrot.slane %v1172_v6, %v2678_v33  ;;  %v1286_v46 = vrot.slane %v1270_v5, %v2678_v33 }
 0x8a6   :  { %v1195_v10 = vrot.slane %v1179_v53, %v2678_v33  ;;  %v1279_v55 = vcombine.high %v1277_v54, %v1277_v54 }
 0x8a7   :  { %v1300_v52 = vrot.slane %v1278_v26, %v2678_v33 }
 0x8a8   :  { %v1307_v38 = vrot.slane %v1279_v55, %v2678_v33  ;;  %v1211_v39 = vcombine.high %v1195_v10, %v1195_v10 }
 0x8a9   :  { %v2021_v57 = vpop.eup %2020  ;;  %v1310_v2 = vcombine.high %v1300_v52, %v1300_v52 }
 0x8aa   :  { %v2023_v58 = vpop.eup %2022 }
 0x8ab   :  { %v1116_v60 = vadd.f32 %v2023_v58, %v2021_v57  ;;  %v2025_v61 = vpop.eup %2024 }
 0x8ac   :  { %v2027_v28 = vpop.eup %2026 }
 0x8ad   :  { %v1117_v27 = vadd.f32 %v2025_v61, %v1116_v60  ;;  %v2029_v8 = vpop.eup %2028  ;;  %v1210_v60 = vcombine.high %v1188_v45, %v1188_v45 }
 0x8ae   :  { %v2031_v13 = vpop.eup %2030 }
 0x8af   :  { %v1118_v7 = vadd.f32 %v2027_v28, %v1117_v27  ;;  %v2033_v18 = vpop.eup %2032 }
 0x8b0   :  { %v2035_v22 = vpop.eup %2034 }
 0x8b1   :  { %v1119_v11 = vadd.f32 %v2029_v8, %v1118_v7 }
 0x8b3   :  { %v1120_v16 = vadd.f32 %v2031_v13, %v1119_v11 }
 0x8b5   :  { %v1121_v41 = vadd.f32 %v2033_v18, %v1120_v16 }
 0x8b7   :  { %v1122_v24 = vadd.f32 %v2035_v22, %v1121_v41  ;;  %v1181_v41 = vcombine.high %v1179_v53, %v1179_v53 }
 0x8b9   :  { %2036 = vrcp.f32 %v1122_v24  ;;  %v1209_v6 = vrot.slane %v1181_v41, %v2678_v33 }
 0x8c6   :  { %v2037_v48 = vpop.eup %2036 }
 0x8c7   :  { %v1125_v34 = vmul.f32 %v2037_v48, %v2021_v57  ;;  %v1127_v35 = vmul.f32 %v2037_v48, %v2023_v58  ;;  %v1132_v37 = vmul.f32 %v2037_v48, %v2025_v61  ;;  %v1137_v44 = vmul.f32 %v2037_v48, %v2027_v28 }
 0x8c8   :  { %v1142_v50 = vmul.f32 %v2037_v48, %v2029_v8  ;;  %v1147_v57 = vmul.f32 %v2037_v48, %v2031_v13  ;;  %v1308_v61 = vcombine.high %v1286_v46, %v1286_v46  ;;  %v1152_v63 = vmul.f32 %v2037_v48, %v2033_v18 }
 0x8c9   :  { %v1126_v0 = vmul.f32 %v1125_v34, %v2617_v12  ;;  %v1128_v42 = vmul.f32 %v1127_v35, %v2630_v1  ;;  %v1133_v49 = vmul.f32 %v1132_v37, %v2611_v43  ;;  %v2695_v12 = vsub.s32 0, %v2673_v29 }
 0x8ca   :  { %v1202_v1 = vrot.slane %v1180_v40, %v2678_v33  ;;  %v1138_v43 = vmul.f32 %v1137_v44, %v2624_v14  ;;  %v1143_v28 = vmul.f32 %v1142_v50, %v2644_v19  ;;  %v1293_v14 = vrot.slane %v1277_v54, %v2678_v33 }
 0x8cb   :  { %v1129_v47 = vadd.f32 %v1128_v42, %v1126_v0  ;;  %v1217_v58 = vrot.slane %v1188_v45, %v2695_v12  ;;  %v1315_v7 = vrot.slane %v1286_v46, %v2695_v12  ;;  %v1148_v13 = vmul.f32 %v1147_v57, %v2637_v17 }
 0x8cc   :  { %v1212_v8 = vcombine.high %v1202_v1, %v1202_v1  ;;  %v1157_v15 = vmul.f32 %v2037_v48, %v2035_v22  ;;  %v1221_v16 = vrot.slane %v1202_v1, %v2695_v12  ;;  %v1319_v20 = vrot.slane %v1300_v52, %v2695_v12 }
 0x8cd   :  { %v1134_v56 = vadd.f32 %v1133_v49, %v1129_v47  ;;  %v1225_v18 = vrot.slane %v1210_v60, %v2695_v12  ;;  %v1323_v19 = vrot.slane %v1308_v61, %v2695_v12  ;;  %v1153_v32 = vmul.f32 %v1152_v63, %v2656_v62 }
 0x8ce   :  { %v1254_v23 = vmul.f32 %v1217_v58, %v2691_v51  ;;  %v1327_v24 = vrot.slane %v1310_v2, %v2695_v12  ;;  %v1355_v25 = vmul.f32 %v2703_v59, %v1315_v7  ;;  %v1229_v17 = vrot.slane %v1212_v8, %v2695_v12 }
 0x8cf   :  { %v1139_v27 = vadd.f32 %v1138_v43, %v1134_v56  ;;  %v1233_v22 = vrot.slane %v1195_v10, %v2695_v12  ;;  %v1158_v31 = vmul.f32 %v1157_v15, %v2650_v21  ;;  %v1255_v3 = vmul.f32 %v1221_v16, %v2691_v51 }
 0x8d0   :  { %v1331_v4 = vrot.slane %v1293_v14, %v2695_v12  ;;  %v1356_v62 = vmul.f32 %v2703_v59, %v1319_v20  ;;  %v1256_v5 = vmul.f32 %v1225_v18, %v2691_v51  ;;  %v1363_v34 = vadd.f32 %v1355_v25, %v1254_v23 }
 0x8d1   :  { %v1144_v11 = vadd.f32 %v1143_v28, %v1139_v27  ;;  %v1357_v35 = vmul.f32 %v2703_v59, %v1323_v19  ;;  %v1358_v37 = vmul.f32 %v2703_v59, %v1327_v24  ;;  %v1257_v26 = vmul.f32 %v1229_v17, %v2691_v51 }
 0x8d2   :  { %v1258_v21 = vmul.f32 %v1233_v22, %v2691_v51  ;;  %v1364_v0 = vadd.f32 %v1356_v62, %v1255_v3  ;;  %v1359_v42 = vmul.f32 %v2703_v59, %v1331_v4  ;;  %v1237_v46 = vrot.slane %v1209_v6, %v2695_v12 }
 0x8d3   :  { %v1149_v36 = vadd.f32 %v1148_v13, %v1144_v11  ;;  %v1365_v45 = vadd.f32 %v1357_v35, %v1256_v5  ;;  %v1309_v47 = vcombine.high %v1293_v14, %v1293_v14  ;;  %v1213_v49 = vcombine.high %v1209_v6, %v1209_v6 }
 0x8d4   :  { %v1461_v52 = vrot.slane %v2691_v51, 4  ;;  %v1366_v54 = vadd.f32 %v1358_v37, %v1257_v26  ;;  %v1335_v56 = vrot.slane %v1307_v38, %v2695_v12  ;;  %v1241_v43 = vrot.slane %v1211_v39, %v2695_v12 }
 0x8d5   :  { %v1154_v30 = vadd.f32 %v1153_v32, %v1149_v36  ;;  %v1311_v57 = vcombine.high %v1307_v38, %v1307_v38  ;;  %v1259_v27 = vmul.f32 %v1237_v46, %v2691_v51  ;;  %v1339_v2 = vrot.slane %v1309_v47, %v2695_v12 }
 0x8d6   :  { %v1245_v7 = vrot.slane %v1213_v49, %v2695_v12  ;;  %v1669_v49 = vld [vmem:[%s2779_s4] ss:$0 sm:$0xff] }
 0x8d7   :  { %v1159_v48 = vadd.f32 %v1158_v31, %v1154_v30  ;;  %v1367_v30 = vadd.f32 %v1359_v42, %v1258_v21  ;;  %v1260_v31 = vmul.f32 %v1241_v43, %v2691_v51  ;;  %v1343_v3 = vrot.slane %v1311_v57, %v2695_v12 }
 0x8d8   :  { %v1261_v21 = vmul.f32 %v1245_v7, %v2691_v51 }
 0x8d9   :  { %v1379_v40 = vrot.slane %v1159_v48, %v2678_v33  ;;  %v1372_v44 = vcombine.high %v1159_v48, %v1159_v48  ;;  %v1362_v38 = vmul.f32 %v2703_v59, %v1343_v3 }
 0x8db   :  { %v1395_v50 = vrot.slane %v1379_v40, %v2678_v33  ;;  %v1387_v1 = vcombine.high %v1379_v40, %v1379_v40  ;;  %v1386_v53 = vrot.slane %v1372_v44, %v2678_v33 }
 0x8dd   :  { %v1424_v58 = vrot.slane %v1395_v50, %v2695_v12  ;;  %v1409_v60 = vrot.slane %v1387_v1, %v2678_v33  ;;  %v1417_v61 = vcombine.high %v1395_v50, %v1395_v50  ;;  %v1402_v63 = vrot.slane %v1386_v53, %v2678_v33 }
 0x8de   :  { %v1388_v28 = vcombine.high %v1386_v53, %v1386_v53 }
 0x8df   :  { %v1463_v8 = vmul.f32 %v1461_v52, %v1424_v58  ;;  %v1428_v10 = vrot.slane %v1409_v60, %v2695_v12  ;;  %v1432_v14 = vrot.slane %v1417_v61, %v2695_v12  ;;  %v1419_v11 = vcombine.high %v1409_v60, %v1409_v60 }
 0x8e0   :  { %v1440_v13 = vrot.slane %v1402_v63, %v2695_v12  ;;  %v1416_v15 = vrot.slane %v1388_v28, %v2678_v33  ;;  %v1418_v16 = vcombine.high %v1402_v63, %v1402_v63  ;;  %v1360_v33 = vmul.f32 %v2703_v59, %v1335_v56 }
 0x8e1   :  { %v1471_v20 = vadd.f32 %v1463_v8, %v1363_v34  ;;  %v1464_v18 = vmul.f32 %v1461_v52, %v1428_v10  ;;  %v1465_v19 = vmul.f32 %v1461_v52, %v1432_v14  ;;  %v1436_v41 = vrot.slane %v1419_v11, %v2695_v12 }
 0x8e2   :  { %v1467_v36 = vmul.f32 %v1461_v52, %v1440_v13  ;;  %v1444_v32 = vrot.slane %v1416_v15, %v2695_v12  ;;  %v1448_v23 = vrot.slane %v1418_v16, %v2695_v12  ;;  %v1420_v24 = vcombine.high %v1416_v15, %v1416_v15 }
 0x8e3   :  { %v1480_v25 = vsel %vm1479_vm2, %v1471_v20, 0.0  ;;  %v1472_v17 = vadd.f32 %v1464_v18, %v1364_v0  ;;  %v1473_v22 = vadd.f32 %v1465_v19, %v1365_v45  ;;  %v1466_v55 = vmul.f32 %v1461_v52, %v1436_v41 }
 0x8e4   :  { %1481 = vadd.xlane.f32.xlu0 %v1480_v25  ;;  %v1468_v5 = vmul.f32 %v1461_v52, %v1444_v32  ;;  %v1452_v6 = vrot.slane %v1420_v24, %v2695_v12  ;;  %v1368_v48 = vadd.f32 %v1360_v33, %v1259_v27  ;;  %v1361_v34 = vmul.f32 %v2703_v59, %v1339_v2 }
 0x8e5   :  { %v1483_v4 = vsel %vm1479_vm2, %v1472_v17, 0.0  ;;  %v1474_v62 = vadd.f32 %v1466_v55, %v1366_v54  ;;  %v1486_v35 = vsel %vm1479_vm2, %v1473_v22, 0.0  ;;  %v1475_v37 = vadd.f32 %v1467_v36, %v1367_v30 }
 0x8e6   :  { %1484 = vadd.xlane.f32.xlu1 %v1483_v4  ;;  %v1469_v26 = vmul.f32 %v1461_v52, %v1448_v23  ;;  %v1476_v40 = vadd.f32 %v1468_v5, %v1368_v48  ;;  %v1369_v0 = vadd.f32 %v1361_v34, %v1260_v31  ;;  %v1470_v42 = vmul.f32 %v1461_v52, %v1452_v6 }
 0x8e7   :  { %v1489_v39 = vsel %vm1479_vm2, %v1474_v62, 0.0  ;;  %v1492_v12 = vsel %vm1479_vm2, %v1475_v37, 0.0  ;;  %v1370_v45 = vadd.f32 %v1362_v38, %v1261_v21  ;;  %v1556_v11 = vsub.s32 %v2604_v9, %v2673_v29 }
 0x8e8   :  { %1487 = vadd.xlane.f32.xlu0 %v1486_v35  ;;  %v1477_v44 = vadd.f32 %v1469_v26, %v1369_v0  ;;  %v1495_v46 = vsel %vm1479_vm2, %v1476_v40, 0.0 }
 0x8e9   :  { %v1478_v47 = vadd.f32 %v1470_v42, %v1370_v45 }
 0x8ea   :  { %1490 = vadd.xlane.f32.xlu1 %v1489_v39  ;;  %v1498_v51 = vsel %vm1479_vm2, %v1477_v44, 0.0 }
 0x8eb   :  { %v1501_v59 = vsel %vm1479_vm2, %v1478_v47, 0.0 }
 0x8ec   :  { %1493 = vadd.xlane.f32.xlu0 %v1492_v12 }
 0x8ee   :  { %1496 = vadd.xlane.f32.xlu1 %v1495_v46 }
 0x8f0   :  { %1499 = vadd.xlane.f32.xlu0 %v1498_v51 }
 0x8f2   :  { %1502 = vadd.xlane.f32.xlu1 %v1501_v59 }
 0x906   :  { %1511 = vbcast.lane.b32.xlu0 %v1669_v49, 256 }
 0x96d   :  { %v1482_v50 = vpop.xlane.xlu0 %1481 }
 0x96f   :  { %v1485_v53 = vpop.xlane.xlu1 %1484 }
 0x971   :  { %v1488_v52 = vpop.xlane.xlu0 %1487 }
 0x973   :  { %v1491_v56 = vpop.xlane.xlu1 %1490 }
 0x975   :  { %v1494_v1 = vpop.xlane.xlu0 %1493 }
 0x977   :  { %v1497_v28 = vpop.xlane.xlu1 %1496 }
 0x979   :  { %v1500_v54 = vpop.xlane.xlu0 %1499 }
 0x97b   :  { %v1503_v7 = vpop.xlane.xlu1 %1502 }
 0x97d   :  { %v1512_v43 = vpop.permute.xlu0 %1511 }
 0x97e   :  { %v1517_v57 = vadd.f32 %v1512_v43, %v1491_v56  ;;  %v1514_v58 = vadd.f32 %v1512_v43, %v1482_v50  ;;  %v1520_v60 = vadd.f32 %v1512_v43, %v1500_v54  ;;  %v1515_v61 = vadd.f32 %v1512_v43, %v1485_v53 }
 0x97f   :  { %v1516_v63 = vadd.f32 %v1512_v43, %v1488_v52  ;;  %v1518_v27 = vadd.f32 %v1512_v43, %v1494_v1  ;;  %v1519_v2 = vadd.f32 %v1512_v43, %v1497_v28  ;;  %v1521_v8 = vadd.f32 %v1512_v43, %v1503_v7 }
 0x980   :  { %1540 = vperm.xlu0 %1907, %v1517_v57   ;;  %1531 = vperm.xlu1 %1906, %v1514_v58  }
 0x984   :  { %1549 = vperm.xlu0 %1907, %v1520_v60   ;;  %1534 = vperm.xlu1 %1906, %v1515_v61  }
 0x988   :  { %1537 = vperm.xlu1 %1906, %v1516_v63  }
 0x98c   :  { %1543 = vperm.xlu1 %1906, %v1518_v27  }
 0x990   :  { %1546 = vperm.xlu1 %1906, %v1519_v2  }
 0x994   :  { %1552 = vperm.xlu1 %1906, %v1521_v8  }
 0x9fb   :  { %v1532_v10 = vpop.permute.xlu1 %1531  ;;  %v1541_v20 = vpop.permute.xlu0 %1540 }
 0x9fc   :  { %v1557_v18 = vrot.slane %v1532_v10, %v1556_v11  ;;  %v1569_v23 = vrot.slane %v1541_v20, %v1556_v11 }
 0x9ff   :  { %v1535_v14 = vpop.permute.xlu1 %1534  ;;  %v1550_v25 = vpop.permute.xlu0 %1549 }
 0xa00   :  { %v1561_v15 = vrot.slane %v1535_v14, %v1556_v11  ;;  %v1581_v55 = vrot.slane %v1550_v25, %v1556_v11 }
 0xa02   :  { %v1587_v41 = vsel %vm1586_vm3, %v1561_v15, %v1557_v18 }
 0xa03   :  { %v1538_v13 = vpop.permute.xlu1 %1537 }
 0xa04   :  { %v1565_v16 = vrot.slane %v1538_v13, %v1556_v11 }
 0xa06   :  { %v1589_v36 = vsel %vm1588_vm4, %v1565_v16, %v1587_v41 }
 0xa07   :  { %v1544_v19 = vpop.permute.xlu1 %1543  ;;  %v1591_v17 = vsel %vm1590_vm5, %v1569_v23, %v1589_v36 }
 0xa08   :  { %v1573_v32 = vrot.slane %v1544_v19, %v1556_v11 }
 0xa0a   :  { %v1593_v9 = vsel %vm1592_vm6, %v1573_v32, %v1591_v17 }
 0xa0b   :  { %v1547_v24 = vpop.permute.xlu1 %1546 }
 0xa0c   :  { %v1577_v22 = vrot.slane %v1547_v24, %v1556_v11 }
 0xa0e   :  { %v1595_v29 = vsel %vm1594_vm7, %v1577_v22, %v1593_v9 }
 0xa0f   :  { %v1553_v30 = vpop.permute.xlu1 %1552  ;;  %v1597_v31 = vsel %vm1596_vm8, %v1581_v55, %v1595_v29 }
 0xa10   :  { %v1585_v33 = vrot.slane %v1553_v30, %v1556_v11 }
 0xa12   :  { %v1599_v3 = vsel %vm1598_vm9, %v1585_v33, %v1597_v31 }
 0xa13   :  { %1602 = vst.msk [vmem:[%s2780_s5] sm:$0xff] %vm1601_vm10, %v1599_v3 }

</bundles_post_ra>
